<compile_context>
chip_gen: v5e
topology: v5e:2x2
jax: 0.10.0
libtpu: 0.0.40
codegen_flags: <defaults>
</compile_context>

<pallas_src>
import functools

import jax
import jax.numpy as jnp
import numpy as np
from jax import lax
from jax.experimental import pallas as pl
from jax.experimental.pallas import tpu as pltpu

_EPS = 1e-5
_PREC = lax.Precision.HIGHEST  # reference uses the same; see TODO above


# ------------------------------ Pallas kernel ------------------------------

def _dot(a, b):
    return jnp.dot(a, b, precision=_PREC, preferred_element_type=jnp.float32)


def _bn_lane(t, g_ref, gamma_ref, beta_ref, cnt, relu):
    """Training-mode BatchNorm computed directly in lane space.

    g_ref is the 0/1 channel-grouping matrix G (L, L): a single (1,L)@(L,L)
    matmul both reduces over same-channel lanes and broadcasts the per-channel
    sums back to every lane of that channel -> 2 tiny matmuls per BN (was 4).
    """
    inv = 1.0 / cnt
    s = _dot(jnp.sum(t, axis=0, keepdims=True), g_ref[...])      # (1, L) channel sums
    q = _dot(jnp.sum(t * t, axis=0, keepdims=True), g_ref[...])  # (1, L) channel sum-sq
    mean = s * inv
    var = jnp.maximum(q * inv - mean * mean, 0.0)                # clamp fp cancellation
    scale = gamma_ref[...] * lax.rsqrt(var + _EPS)               # EUP
    shift = beta_ref[...] - mean * scale
    y = t * scale + shift
    return jnp.maximum(y, 0.0) if relu else y


def residual_block_kernel(x_ref, m1_ref, m2_ref, g_ref, mask1_ref,
                          g1_ref, b1_ref, g2_ref, b2_ref,
                          o_ref, hbuf, *, rows, cnt1, cnt2):
    mask1 = mask1_ref[...]

    # H taps of the input are static sublane slices of the (rows+8)-row slab
    # (rows >= `rows` are zero) -- no (N*H)^2 shift-matrix matmul.
    x0 = x_ref[pl.ds(0, rows), :]   # tap kh=0 : row h
    x1 = x_ref[pl.ds(1, rows), :]   # tap kh=1 : row h+1 (last row reads the zero pad)

    # conv1 (2x2, stride 1, VALID): ONE fused MXU matmul, K = 2*L.
    t1 = _dot(jnp.concatenate([x0, x1], axis=1), m1_ref[...])
    t1 = t1 * mask1                 # zero invalid rows/lanes (BN stats + conv2 padding)
    h1 = _bn_lane(t1, g_ref, g1_ref, b1_ref, cnt1, relu=True) * mask1

    # conv2 (2x2, stride 1, pad 1): its kh=0 tap needs rows shifted down by one.
    # Do the shift through the VMEM scratch: only scratch row 0 must be zero
    # (it supplies conv2's top padding row); rows 1..7 are overwritten below.
    hbuf[pl.ds(0, 8), :] = jnp.zeros((8, h1.shape[1]), jnp.float32)
    hbuf[pl.ds(1, rows), :] = h1
    hd = hbuf[pl.ds(0, rows), :]    # hd[r] = h1[r-1], hd[0] = 0
    t2 = _dot(jnp.concatenate([hd, h1], axis=1), m2_ref[...])
    y = _bn_lane(t2, g_ref, g2_ref, b2_ref, cnt2, relu=False)

    # residual add + final ReLU; fully lane-dense (128-lane) store.
    o_ref[...] = jnp.maximum(y + x0, 0.0)


# --------------------- operand preparation (host side) ---------------------

def _conv_tap_matrices(w_oihw, w_slots, pad, win_valid, wout_valid):
    """Per-image W-tap + channel-mix matrices, one per H tap kh.

    M[kh, win*C + cin, wout*C + cout] = w[cout, cin, kh, kw] with
    win = wout + kw - pad, kw in {0,1}, 0 <= wout < wout_valid, 0 <= win < win_valid.
    """
    c = w_oihw.shape[0]
    wk = np.transpose(np.asarray(w_oihw, np.float32), (2, 3, 1, 0))  # (kh,kw,cin,cout)
    m = np.zeros((2, w_slots * c, w_slots * c), np.float32)
    for kh in range(2):
        for wout in range(wout_valid):
            for kw in range(2):
                win = wout + kw - pad
                if 0 <= win < win_valid:
                    m[kh, win * c:(win + 1) * c, wout * c:(wout + 1) * c] = wk[kh, kw]
    return m


def prepare_residual_block_operands(params, n, c, h, w):
    """Dense f32 operand matrices, precomputed once per parameter set."""
    w1, _b1, g1, be1, w2, _b2, g2, be2 = params  # conv biases: exact no-op before batch-stat BN
    eye_n = np.eye(n, dtype=np.float32)
    t1 = _conv_tap_matrices(w1, w, pad=0, win_valid=w, wout_valid=w - 1)
    t2 = _conv_tap_matrices(w2, w, pad=1, win_valid=w - 1, wout_valid=w)
    # Fused conv matrices: rows [0:L) multiply tap kh=0, rows [L:2L) tap kh=1;
    # block-diagonal over the batch images packed along lanes.
    m1 = np.concatenate([np.kron(eye_n, t1[0]), np.kron(eye_n, t1[1])], axis=0)
    m2 = np.concatenate([np.kron(eye_n, t2[0]), np.kron(eye_n, t2[1])], axis=0)
    # 0/1 channel-grouping matrix: G[i, j] = 1 iff lanes i, j hold the same channel.
    gmat = np.kron(np.ones((n * w, n * w), np.float32), np.eye(c, dtype=np.float32))
    # conv1-output validity mask (rows h <= H-2, lane slots w <= W-2).
    lane_ok = np.kron(np.ones(n, np.float32),
                      np.kron((np.arange(w) < w - 1).astype(np.float32),
                              np.ones(c, np.float32)))
    row_ok = (np.arange(h) < h - 1).astype(np.float32)
    mask1 = row_ok[:, None] * lane_ok[None, :]
    lane_vec = lambda v: np.tile(np.asarray(v, np.float32), n * w)[None, :]
    ops = (m1, m2, gmat, mask1, lane_vec(g1), lane_vec(be1), lane_vec(g2), lane_vec(be2))
    return tuple(jnp.asarray(o) for o in ops)


def residual_block(x_nchw, operands):
    """x_nchw: (N, C, H, W) float32 (PyTorch layout). Returns (N, C, H, W)."""
    n, c, h, w = x_nchw.shape
    lanes = n * w * c  # 128 for the toy shape -> fully lane-dense slab
    # NCHW -> packed slab: slab[h, n*W*C + w*C + c] = x[n, c, h, w];
    # 8 trailing zero rows give the in-kernel H-tap slices a zero row to read.
    slab = jnp.transpose(x_nchw, (2, 0, 3, 1)).reshape(h, lanes).astype(jnp.float32)
    xs = jnp.concatenate([slab, jnp.zeros((8, lanes), jnp.float32)], axis=0)

    vmem = pl.BlockSpec(memory_space=pltpu.MemorySpace.VMEM)
    kernel = functools.partial(residual_block_kernel, rows=h,
                               cnt1=float(n * (h - 1) * (w - 1)),
                               cnt2=float(n * h * w))
    out = pl.pallas_call(
        kernel,
        out_shape=jax.ShapeDtypeStruct((h, lanes), jnp.float32),
        in_specs=[vmem] * 9,
        out_specs=vmem,
        scratch_shapes=[pltpu.VMEM((h + 8, lanes), jnp.float32)],
    )(xs, *operands)
    return jnp.transpose(out.reshape(h, n, w, c), (1, 3, 0, 2))


# --------------------- deterministic parameter setup ---------------------

def make_params(key, C):
    ks = jax.random.split(key, 8)
    # PyTorch Conv2d weight layout: (Cout, Cin, kH, kW)
    w1 = jax.random.normal(ks[0], (C, C, 2, 2), jnp.float32) * 0.3
    b1 = jax.random.normal(ks[1], (C,), jnp.float32) * 0.1
    w2 = jax.random.normal(ks[2], (C, C, 2, 2), jnp.float32) * 0.3
    b2 = jax.random.normal(ks[3], (C,), jnp.float32) * 0.1
    g1 = 1.0 + 0.1 * jax.random.normal(ks[4], (C,), jnp.float32)
    be1 = 0.1 * jax.random.normal(ks[5], (C,), jnp.float32)
    g2 = 1.0 + 0.1 * jax.random.normal(ks[6], (C,), jnp.float32)
    be2 = 0.1 * jax.random.normal(ks[7], (C,), jnp.float32)
    return (w1, b1, g1, be1, w2, b2, g2, be2)


# --------------------------- pure-JAX reference ---------------------------

def _bn_ref(t, gamma, beta, eps=_EPS):
    mean = jnp.mean(t, axis=(0, 1, 2), keepdims=True)
    var = jnp.mean((t - mean) ** 2, axis=(0, 1, 2), keepdims=True)
    return (t - mean) * lax.rsqrt(var + eps) * gamma + beta


def _conv_ref(x_nhwc, w_oihw, b, padding):
    w_hwio = jnp.transpose(w_oihw, (2, 3, 1, 0))
    dn = lax.conv_dimension_numbers(x_nhwc.shape, w_hwio.shape, ('NHWC', 'HWIO', 'NHWC'))
    y = lax.conv_general_dilated(x_nhwc, w_hwio, (1, 1), padding,
                                 dimension_numbers=dn, precision=_PREC)
    return y + b


def reference_forward(x_nchw, p):
    w1, b1, g1, be1, w2, b2, g2, be2 = p
    x = jnp.transpose(x_nchw, (0, 2, 3, 1))
    h = _conv_ref(x, w1, b1, 'VALID')
    h = jnp.maximum(_bn_ref(h, g1, be1), 0.0)
    y = _conv_ref(h, w2, b2, [(1, 1), (1, 1)])
    y = _bn_ref(y, g2, be2)
    out = jnp.maximum(y + x, 0.0)
    return jnp.transpose(out, (0, 3, 1, 2))


if __name__ == "__main__":
    N, C, H, W = 2, 4, 16, 16
    key = jax.random.PRNGKey(0)
    kx, kp = jax.random.split(key)
    x = jax.random.normal(kx, (N, C, H, W), jnp.float32)

    params = make_params(kp, C)
    operands = prepare_residual_block_operands(params, N, C, H, W)

    out = residual_block(x, operands)
    out = jax.block_until_ready(out)

    ref = reference_forward(x, params)
    assert out.shape == (N, C, H, W)
    assert bool(jnp.allclose(out, ref, atol=1e-4, rtol=1e-3)), "mismatch vs reference"
    print("KERNEL_OK")
</pallas_src>

<mosaic_0001>
module attributes {stable_mosaic.version = 11 : i64} {
  func.func @residual_block_kernel(%arg0: memref<24x128xf32, #tpu.memory_space<vmem>>, %arg1: memref<256x128xf32, #tpu.memory_space<vmem>>, %arg2: memref<256x128xf32, #tpu.memory_space<vmem>>, %arg3: memref<128x128xf32, #tpu.memory_space<vmem>>, %arg4: memref<16x128xf32, #tpu.memory_space<vmem>>, %arg5: memref<1x128xf32, #tpu.memory_space<vmem>>, %arg6: memref<1x128xf32, #tpu.memory_space<vmem>>, %arg7: memref<1x128xf32, #tpu.memory_space<vmem>>, %arg8: memref<1x128xf32, #tpu.memory_space<vmem>>, %arg9: memref<16x128xf32, #tpu.memory_space<vmem>>, %arg10: memref<24x128xf32, #tpu.memory_space<vmem>>) attributes {dimension_semantics = [], scalar_prefetch = 0 : i64, scratch_operands = 1 : i64, tpu.core_type = #tpu.core_type<tc>} {
    %c0 = arith.constant 0 : index
    %c0_0 = arith.constant 0 : index
    %0 = vector.load %arg4[%c0, %c0_0] : memref<16x128xf32, #tpu.memory_space<vmem>>, vector<16x128xf32>
    %c0_1 = arith.constant 0 : index
    %c0_2 = arith.constant 0 : index
    %1 = vector.load %arg0[%c0_1, %c0_2] : memref<24x128xf32, #tpu.memory_space<vmem>>, vector<16x128xf32>
    %c1 = arith.constant 1 : index
    %c0_3 = arith.constant 0 : index
    %2 = vector.load %arg0[%c1, %c0_3] : memref<24x128xf32, #tpu.memory_space<vmem>>, vector<16x128xf32>
    %3 = tpu.concatenate %1, %2 in 1 : vector<16x128xf32>, vector<16x128xf32> -> vector<16x256xf32>
    %c0_4 = arith.constant 0 : index
    %c0_5 = arith.constant 0 : index
    %4 = vector.load %arg1[%c0_4, %c0_5] : memref<256x128xf32, #tpu.memory_space<vmem>>, vector<256x128xf32>
    %cst = arith.constant dense<0.000000e+00> : vector<16x128xf32>
    %5 = tpu.matmul %3, %4, %cst {dimension_numbers = #tpu.dot_dimension_numbers<[1], [0], [0], [1], [0, 0, 1, 1], [], []>, precision = #tpu.contract_precision<fp32>} : vector<16x256xf32>, vector<256x128xf32>, vector<16x128xf32> -> vector<16x128xf32>
    %6 = arith.mulf %5, %0 : vector<16x128xf32>
    %cst_6 = arith.constant dense<0.000000e+00> : vector<128xf32>
    %7 = vector.multi_reduction <add>, %6, %cst_6 [0] : vector<16x128xf32> to vector<128xf32>
    %8 = vector.shape_cast %7 : vector<128xf32> to vector<1x128xf32>
    %c0_7 = arith.constant 0 : index
    %c0_8 = arith.constant 0 : index
    %9 = vector.load %arg3[%c0_7, %c0_8] : memref<128x128xf32, #tpu.memory_space<vmem>>, vector<128x128xf32>
    %cst_9 = arith.constant dense<0.000000e+00> : vector<1x128xf32>
    %10 = tpu.matmul %8, %9, %cst_9 {dimension_numbers = #tpu.dot_dimension_numbers<[1], [0], [0], [1], [0, 0, 1, 1], [], []>, precision = #tpu.contract_precision<fp32>} : vector<1x128xf32>, vector<128x128xf32>, vector<1x128xf32> -> vector<1x128xf32>
    %11 = arith.mulf %6, %6 : vector<16x128xf32>
    %cst_10 = arith.constant dense<0.000000e+00> : vector<128xf32>
    %12 = vector.multi_reduction <add>, %11, %cst_10 [0] : vector<16x128xf32> to vector<128xf32>
    %13 = vector.shape_cast %12 : vector<128xf32> to vector<1x128xf32>
    %c0_11 = arith.constant 0 : index
    %c0_12 = arith.constant 0 : index
    %14 = vector.load %arg3[%c0_11, %c0_12] : memref<128x128xf32, #tpu.memory_space<vmem>>, vector<128x128xf32>
    %cst_13 = arith.constant dense<0.000000e+00> : vector<1x128xf32>
    %15 = tpu.matmul %13, %14, %cst_13 {dimension_numbers = #tpu.dot_dimension_numbers<[1], [0], [0], [1], [0, 0, 1, 1], [], []>, precision = #tpu.contract_precision<fp32>} : vector<1x128xf32>, vector<128x128xf32>, vector<1x128xf32> -> vector<1x128xf32>
    %cst_14 = arith.constant 0.00222222228 : f32
    %16 = vector.broadcast %cst_14 : f32 to vector<1x128xf32>
    %17 = arith.mulf %10, %16 : vector<1x128xf32>
    %cst_15 = arith.constant 0.00222222228 : f32
    %18 = vector.broadcast %cst_15 : f32 to vector<1x128xf32>
    %19 = arith.mulf %15, %18 : vector<1x128xf32>
    %20 = arith.mulf %17, %17 : vector<1x128xf32>
    %21 = arith.subf %19, %20 : vector<1x128xf32>
    %cst_16 = arith.constant 0.000000e+00 : f32
    %22 = vector.broadcast %cst_16 : f32 to vector<1x128xf32>
    %23 = arith.maximumf %21, %22 : vector<1x128xf32>
    %c0_17 = arith.constant 0 : index
    %c0_18 = arith.constant 0 : index
    %24 = vector.load %arg5[%c0_17, %c0_18] : memref<1x128xf32, #tpu.memory_space<vmem>>, vector<1x128xf32>
    %cst_19 = arith.constant 9.99999974E-6 : f32
    %25 = vector.broadcast %cst_19 : f32 to vector<1x128xf32>
    %26 = arith.addf %23, %25 : vector<1x128xf32>
    %27 = math.rsqrt %26 : vector<1x128xf32>
    %28 = arith.mulf %24, %27 : vector<1x128xf32>
    %c0_20 = arith.constant 0 : index
    %c0_21 = arith.constant 0 : index
    %29 = vector.load %arg6[%c0_20, %c0_21] : memref<1x128xf32, #tpu.memory_space<vmem>>, vector<1x128xf32>
    %30 = arith.mulf %17, %28 : vector<1x128xf32>
    %31 = arith.subf %29, %30 : vector<1x128xf32>
    %32 = vector.broadcast %28 : vector<1x128xf32> to vector<16x128xf32>
    %33 = arith.mulf %6, %32 : vector<16x128xf32>
    %34 = vector.broadcast %31 : vector<1x128xf32> to vector<16x128xf32>
    %35 = arith.addf %33, %34 : vector<16x128xf32>
    %cst_22 = arith.constant 0.000000e+00 : f32
    %36 = vector.broadcast %cst_22 : f32 to vector<16x128xf32>
    %37 = arith.maximumf %35, %36 : vector<16x128xf32>
    %38 = arith.mulf %37, %0 : vector<16x128xf32>
    %cst_23 = arith.constant 0.000000e+00 : f32
    %39 = vector.broadcast %cst_23 : f32 to vector<8x128xf32>
    %c0_24 = arith.constant 0 : index
    %c0_25 = arith.constant 0 : index
    %40 = vector.load %arg10[%c0_24, %c0_25] : memref<24x128xf32, #tpu.memory_space<vmem>>, vector<8x128xf32>
    tpu.vector_store %arg10[%c0_24, %c0_25], %39 {strides = array<i32>} : memref<24x128xf32, #tpu.memory_space<vmem>>, vector<8x128xf32>,
    %c1_26 = arith.constant 1 : index
    %c0_27 = arith.constant 0 : index
    %41 = vector.load %arg10[%c1_26, %c0_27] : memref<24x128xf32, #tpu.memory_space<vmem>>, vector<16x128xf32>
    tpu.vector_store %arg10[%c1_26, %c0_27], %38 {strides = array<i32>} : memref<24x128xf32, #tpu.memory_space<vmem>>, vector<16x128xf32>,
    %c0_28 = arith.constant 0 : index
    %c0_29 = arith.constant 0 : index
    %42 = vector.load %arg10[%c0_28, %c0_29] : memref<24x128xf32, #tpu.memory_space<vmem>>, vector<16x128xf32>
    %43 = tpu.concatenate %42, %38 in 1 : vector<16x128xf32>, vector<16x128xf32> -> vector<16x256xf32>
    %c0_30 = arith.constant 0 : index
    %c0_31 = arith.constant 0 : index
    %44 = vector.load %arg2[%c0_30, %c0_31] : memref<256x128xf32, #tpu.memory_space<vmem>>, vector<256x128xf32>
    %cst_32 = arith.constant dense<0.000000e+00> : vector<16x128xf32>
    %45 = tpu.matmul %43, %44, %cst_32 {dimension_numbers = #tpu.dot_dimension_numbers<[1], [0], [0], [1], [0, 0, 1, 1], [], []>, precision = #tpu.contract_precision<fp32>} : vector<16x256xf32>, vector<256x128xf32>, vector<16x128xf32> -> vector<16x128xf32>
    %cst_33 = arith.constant dense<0.000000e+00> : vector<128xf32>
    %46 = vector.multi_reduction <add>, %45, %cst_33 [0] : vector<16x128xf32> to vector<128xf32>
    %47 = vector.shape_cast %46 : vector<128xf32> to vector<1x128xf32>
    %c0_34 = arith.constant 0 : index
    %c0_35 = arith.constant 0 : index
    %48 = vector.load %arg3[%c0_34, %c0_35] : memref<128x128xf32, #tpu.memory_space<vmem>>, vector<128x128xf32>
    %cst_36 = arith.constant dense<0.000000e+00> : vector<1x128xf32>
    %49 = tpu.matmul %47, %48, %cst_36 {dimension_numbers = #tpu.dot_dimension_numbers<[1], [0], [0], [1], [0, 0, 1, 1], [], []>, precision = #tpu.contract_precision<fp32>} : vector<1x128xf32>, vector<128x128xf32>, vector<1x128xf32> -> vector<1x128xf32>
    %50 = arith.mulf %45, %45 : vector<16x128xf32>
    %cst_37 = arith.constant dense<0.000000e+00> : vector<128xf32>
    %51 = vector.multi_reduction <add>, %50, %cst_37 [0] : vector<16x128xf32> to vector<128xf32>
    %52 = vector.shape_cast %51 : vector<128xf32> to vector<1x128xf32>
    %c0_38 = arith.constant 0 : index
    %c0_39 = arith.constant 0 : index
    %53 = vector.load %arg3[%c0_38, %c0_39] : memref<128x128xf32, #tpu.memory_space<vmem>>, vector<128x128xf32>
    %cst_40 = arith.constant dense<0.000000e+00> : vector<1x128xf32>
    %54 = tpu.matmul %52, %53, %cst_40 {dimension_numbers = #tpu.dot_dimension_numbers<[1], [0], [0], [1], [0, 0, 1, 1], [], []>, precision = #tpu.contract_precision<fp32>} : vector<1x128xf32>, vector<128x128xf32>, vector<1x128xf32> -> vector<1x128xf32>
    %cst_41 = arith.constant 0.001953125 : f32
    %55 = vector.broadcast %cst_41 : f32 to vector<1x128xf32>
    %56 = arith.mulf %49, %55 : vector<1x128xf32>
    %cst_42 = arith.constant 0.001953125 : f32
    %57 = vector.broadcast %cst_42 : f32 to vector<1x128xf32>
    %58 = arith.mulf %54, %57 : vector<1x128xf32>
    %59 = arith.mulf %56, %56 : vector<1x128xf32>
    %60 = arith.subf %58, %59 : vector<1x128xf32>
    %cst_43 = arith.constant 0.000000e+00 : f32
    %61 = vector.broadcast %cst_43 : f32 to vector<1x128xf32>
    %62 = arith.maximumf %60, %61 : vector<1x128xf32>
    %c0_44 = arith.constant 0 : index
    %c0_45 = arith.constant 0 : index
    %63 = vector.load %arg7[%c0_44, %c0_45] : memref<1x128xf32, #tpu.memory_space<vmem>>, vector<1x128xf32>
    %cst_46 = arith.constant 9.99999974E-6 : f32
    %64 = vector.broadcast %cst_46 : f32 to vector<1x128xf32>
    %65 = arith.addf %62, %64 : vector<1x128xf32>
    %66 = math.rsqrt %65 : vector<1x128xf32>
    %67 = arith.mulf %63, %66 : vector<1x128xf32>
    %c0_47 = arith.constant 0 : index
    %c0_48 = arith.constant 0 : index
    %68 = vector.load %arg8[%c0_47, %c0_48] : memref<1x128xf32, #tpu.memory_space<vmem>>, vector<1x128xf32>
    %69 = arith.mulf %56, %67 : vector<1x128xf32>
    %70 = arith.subf %68, %69 : vector<1x128xf32>
    %71 = vector.broadcast %67 : vector<1x128xf32> to vector<16x128xf32>
    %72 = arith.mulf %45, %71 : vector<16x128xf32>
    %73 = vector.broadcast %70 : vector<1x128xf32> to vector<16x128xf32>
    %74 = arith.addf %72, %73 : vector<16x128xf32>
    %75 = arith.addf %74, %1 : vector<16x128xf32>
    %cst_49 = arith.constant 0.000000e+00 : f32
    %76 = vector.broadcast %cst_49 : f32 to vector<16x128xf32>
    %77 = arith.maximumf %75, %76 : vector<16x128xf32>
    %c0_50 = arith.constant 0 : index
    %c0_51 = arith.constant 0 : index
    %78 = vector.load %arg9[%c0_50, %c0_51] : memref<16x128xf32, #tpu.memory_space<vmem>>, vector<16x128xf32>
    tpu.vector_store %arg9[%c0_50, %c0_51], %77 {strides = array<i32>} : memref<16x128xf32, #tpu.memory_space<vmem>>, vector<16x128xf32>,
    return
  }
}

</mosaic_0001>

<bundles_post_ra>
// kernel: tpu_custom_call.1
= control target key start
LH: loop header
LB: loop body
LE: loop exit
PB: predicated region body
PF: predicated region fallthrough
CT: control target
= control target key end

     0   :  { %14 = vsyncpa [#allocation4], 0  ;;  %s5346_s0 = inlined_call_operand.hbm [shape: f32[24,128], index: 0, kind: input, shape index: {}]   ;;  %s5347_s1 = inlined_call_operand.hbm [shape: f32[256,128], index: 1, kind: input, shape index: {}]   ;;  %s5348_s2 = inlined_call_operand.hbm [shape: f32[256,128], index: 2, kind: input, shape index: {}]   ;;  %s5349_s3 = inlined_call_operand.hbm [shape: f32[128,128], index: 3, kind: input, shape index: {}]   ;;  %s5350_s4 = inlined_call_operand.hbm [shape: f32[16,128], index: 4, kind: input, shape index: {}]   ;;  %s5351_s5 = inlined_call_operand.vmem [shape: f32[1,128], index: 5, kind: input, shape index: {}]   ;;  %s5352_s6 = inlined_call_operand.vmem [shape: f32[1,128], index: 6, kind: input, shape index: {}]   ;;  %s5353_s7 = inlined_call_operand.vmem [shape: f32[1,128], index: 7, kind: input, shape index: {}]   ;;  %s5354_s8 = inlined_call_operand.vmem [shape: f32[1,128], index: 8, kind: input, shape index: {}]   ;;  %s5355_s9 = inlined_call_operand.hbm [shape: f32[16,128], index: 9, kind: output, shape index: {}]  }
   0x1   :  { %15 = vsyncpa [#allocation7], 0 }
   0x2   :  { %16 = vsyncpa [#allocation10], 0 }
   0x3   :  { %17 = vsyncpa [#allocation5], 0  ;;  %s35_s11 = sshll.u32 %s5347_s1, 4  ;;  %s3364_s12 = smov [#allocation6]   ;;  %s36_s11 = int_to_ptr.hbm [resolvable:$true] %s35_s11 }
   0x4   :  { %s37_s13 = sshll.u32 %s3364_s12, 4  ;;  %s61_s16 = sshll.u32 %s5349_s3, 4  ;;  %s38_s13 = int_to_ptr.vmem [resolvable:$true] %s37_s13  ;;  %s62_s16 = int_to_ptr.hbm [resolvable:$true] %s61_s16 }
   0x5   :  { %s3365_s17 = smov 128   ;;  %s3366_s18 = smov 8  }
   0x6   :  { %43 = dma.hbm_to_vmem [thread:$0]  %s36_s11, 4096, %s38_s13, [#allocation7], %s3365_s17, %s3365_s17, %s3366_s18  }
   0x7   :  { %s3367_s19 = smov [#allocation9]   ;;  %s22_s1 = sshll.u32 %s5346_s0, 4  ;;  %s23_s1 = int_to_ptr.hbm [resolvable:$true] %s22_s1 }
   0x8   :  { %s63_s20 = sshll.u32 %s3367_s19, 4  ;;  %s48_s24 = sshll.u32 %s5348_s2, 4  ;;  %s64_s20 = int_to_ptr.vmem [resolvable:$true] %s63_s20  ;;  %s49_s24 = int_to_ptr.hbm [resolvable:$true] %s48_s24 }
   0x9   :  { %69 = dma.hbm_to_vmem [thread:$0]  %s62_s16, 2048, %s64_s20, [#allocation10], %s3365_s17, %s3365_s17, %s3366_s18  }
   0xa   :  { %s3368_s25 = smov [#allocation3]   ;;  %s3369_s27 = smov [#allocation8]  }
   0xb   :  { %s24_s26 = sshll.u32 %s3368_s25, 4  ;;  %s50_s0 = sshll.u32 %s3369_s27, 4  ;;  %s25_s26 = int_to_ptr.vmem [resolvable:$true] %s24_s26  ;;  %s51_s0 = int_to_ptr.vmem [resolvable:$true] %s50_s0 }
   0xc   :  { %30 = dma.hbm_to_vmem [thread:$0]  %s23_s1, 384, %s25_s26, [#allocation4], %s3365_s17, %s3365_s17, %s3366_s18  }
   0xd   :  { %s74_s30 = sshll.u32 %s5350_s4, 4  ;;  %s3370_s2 = smov [#allocation11]   ;;  %s75_s30 = int_to_ptr.hbm [resolvable:$true] %s74_s30 }
   0xe   :  { %56 = dma.hbm_to_vmem [thread:$0]  %s49_s24, 4096, %s51_s0, [#allocation7], %s3365_s17, %s3365_s17, %s3366_s18  }
   0xf   :  { %s76_s10 = sshll.u32 %s3370_s2, 4  ;;  %s77_s10 = int_to_ptr.vmem [resolvable:$true] %s76_s10 }
  0x10   :  { %82 = dma.hbm_to_vmem [thread:$0]  %s75_s30, 256, %s77_s10, [#allocation10], %s3365_s17, %s3365_s17, %s3366_s18  }
  0x11   :  { %3356 = dma.done.wait [#allocation4], 384  }
  0x12   :  { %3357 = vsyncadd [#allocation4], 4294966912 }
  0x13   :  { %3358 = dma.done.wait [#allocation7], 8192  }
  0x14   :  { %3359 = vsyncadd [#allocation7], 4294959104 }
  0x15   :  { %3360 = dma.done.wait [#allocation10], 2304  }
  0x16   :  { %3361 = vsyncadd [#allocation10], 4294964992  ;;  %v132_v0 = vld [vmem:[#allocation6 + $0x78] sm:$0xff]  ;;  %v131_v1 = vld [vmem:[#allocation6 + $0x70] sm:$0xff] }
  0x17   :  { %v130_v2 = vld [vmem:[#allocation6 + $0x68] sm:$0xff]  ;;  %v3453_v3 = vand.u32 4294901760, %v132_v0  ;;  %v3455_v4 = vand.u32 4294901760, %v131_v1  ;;  %v129_v6 = vld [vmem:[#allocation6 + $0x60] sm:$0xff]  ;;  %v128_v7 = vld [vmem:[#allocation6 + $0x58] sm:$0xff] }
  0x18   :  { %v3457_v5 = vand.u32 4294901760, %v130_v2  ;;  %v127_v8 = vld [vmem:[#allocation6 + $0x50] sm:$0xff]  ;;  %v3459_v9 = vand.u32 4294901760, %v129_v6  ;;  %v3461_v10 = vand.u32 4294901760, %v128_v7  ;;  %v126_v12 = vld [vmem:[#allocation6 + $0x48] sm:$0xff]  ;;  %v125_v13 = vld [vmem:[#allocation6 + $0x40] sm:$0xff] }
  0x19   :  { %v3463_v11 = vand.u32 4294901760, %v127_v8  ;;  %150 = vmatpush.msra.mxu0 %v3453_v3  ;;  %v3467_v14 = vsub.f32 %v132_v0, %v3453_v3  ;;  %v3470_v15 = vsub.f32 %v131_v1, %v3455_v4  ;;  %363 = vmatpush.msra.mxu3 %v3453_v3  ;;  %v3476_v17 = vand.u32 4294901760, %v126_v12  ;;  %v124_v18 = vld [vmem:[#allocation6 + $0x38] sm:$0xff]  ;;  %v123_v26 = vld [vmem:[#allocation6 + $0x30] sm:$0xff]  ;;  %v122_v36 = vld [vmem:[#allocation6 + $0x28] sm:$0xff] }
  0x1a   :  { %v3474_v16 = vsub.f32 %v130_v2, %v3457_v5  ;;  %v3479_v19 = vsub.f32 %v129_v6, %v3459_v9  ;;  %v3482_v20 = vsub.f32 %v128_v7, %v3461_v10  ;;  %v3492_v25 = vand.u32 4294901760, %v125_v13  ;;  %v121_v42 = vld [vmem:[#allocation6 + $0x20] sm:$0xff]  ;;  %v120_v48 = vld [vmem:[#allocation6 + $0x18] sm:$0xff]  ;;  %v119_v54 = vld [vmem:[#allocation6 + $0x10] sm:$0xff] }
  0x1b   :  { %v3485_v21 = vsub.f32 %v127_v8, %v3463_v11  ;;  %152 = vmatpush.msra.mxu0 %v3455_v4  ;;  %305 = vmatpush.msra.mxu2 %v3467_v14  ;;  %v200_v22 = vand.u32 4294901760, %v3467_v14  ;;  %v5372_v23 = vand.u32 4294901760, %v3470_v15  ;;  %v3496_v28 = vand.u32 4294901760, %v124_v18  ;;  %v148_v59 = vld [vmem:[#allocation6 + $0xf8] sm:$0xff]  ;;  %v118_v61 = vld [vmem:[#allocation6 + $0x8] sm:$0xff]  ;;  %v117_v2 = vld [vmem:[#allocation6] sm:$0xff] }
  0x1c   :  { %v5369_v24 = vand.u32 4294901760, %v3474_v16  ;;  %365 = vmatpush.msra.mxu3 %v3455_v4  ;;  %v5368_v27 = vand.u32 4294901760, %v3479_v19  ;;  %v3499_v29 = vsub.f32 %v126_v12, %v3476_v17  ;;  %v5365_v33 = vand.u32 4294901760, %v3482_v20  ;;  %v147_v6 = vld [vmem:[#allocation6 + $0xf0] sm:$0xff] }
  0x1d   :  { %154 = vmatpush.msra.mxu0 %v3457_v5  ;;  %308 = vmatpush.msra.mxu2 %v3470_v15  ;;  %v201_v30 = vsub.f32 %v3467_v14, %v200_v22  ;;  %v207_v31 = vsub.f32 %v3470_v15, %v5372_v23  ;;  %v3514_v34 = vand.u32 4294901760, %v123_v26  ;;  %v5364_v35 = vand.u32 4294901760, %v3485_v21  ;;  %v139_v23 = vld [vmem:[#allocation6 + $0xb0] sm:$0xff] }
  0x1e   :  { %v213_v32 = vsub.f32 %v3474_v16, %v5369_v24  ;;  %367 = vmatpush.msra.mxu3 %v3457_v5  ;;  %v219_v39 = vsub.f32 %v3479_v19, %v5368_v27  ;;  %v3523_v40 = vsub.f32 %v125_v13, %v3492_v25  ;;  %v5362_v41 = vand.u32 4294901760, %v3499_v29 }
  0x1f   :  { %156 = vmatpush.msra.mxu0 %v3459_v9  ;;  %v202_v37 = vand.u32 4294901760, %v201_v30  ;;  %311 = vmatpush.msra.mxu2 %v3474_v16  ;;  %v208_v38 = vand.u32 4294901760, %v207_v31  ;;  %v225_v44 = vsub.f32 %v3482_v20, %v5365_v33  ;;  %v3531_v45 = vand.u32 4294901760, %v122_v36  ;;  %v146_v30 = vld [vmem:[#allocation6 + $0xe8] sm:$0xff] }
  0x20   :  { %369 = vmatpush.msra.mxu3 %v3459_v9  ;;  %v214_v43 = vand.u32 4294901760, %v213_v32  ;;  %v3534_v46 = vsub.f32 %v124_v18, %v3496_v28  ;;  %v231_v47 = vsub.f32 %v3485_v21, %v5364_v35  ;;  %v220_v49 = vand.u32 4294901760, %v219_v39 }
  0x21   :  { %158 = vmatpush.msra.mxu0 %v3461_v10  ;;  %203 = vmatpush.msra.mxu1 %v202_v37  ;;  %v3542_v50 = vand.u32 4294901760, %v121_v42  ;;  %v5361_v51 = vand.u32 4294901760, %v3523_v40  ;;  %v3546_v52 = vsub.f32 %v123_v26, %v3514_v34  ;;  %v237_v53 = vsub.f32 %v3499_v29, %v5362_v41 }
  0x22   :  { %314 = vmatpush.msra.mxu2 %v3479_v19  ;;  %371 = vmatpush.msra.mxu3 %v3461_v10  ;;  %v226_v55 = vand.u32 4294901760, %v225_v44  ;;  %v3554_v56 = vand.u32 4294901760, %v120_v48  ;;  %v5359_v57 = vand.u32 4294901760, %v3534_v46  ;;  %v3558_v58 = vsub.f32 %v122_v36, %v3531_v45  ;;  %v145_v44 = vld [vmem:[#allocation6 + $0xe0] sm:$0xff] }
  0x23   :  { %160 = vmatpush.msra.mxu0 %v3463_v11  ;;  %209 = vmatpush.msra.mxu1 %v208_v38  ;;  %v232_v60 = vand.u32 4294901760, %v231_v47  ;;  %v243_v62 = vsub.f32 %v3523_v40, %v5361_v51  ;;  %v3566_v63 = vand.u32 4294901760, %v119_v54  ;;  %v5358_v0 = vand.u32 4294901760, %v3546_v52 }
  0x24   :  { %317 = vmatpush.msra.mxu2 %v3482_v20  ;;  %373 = vmatpush.msra.mxu3 %v3463_v11  ;;  %v3570_v1 = vsub.f32 %v121_v42, %v3542_v50  ;;  %v238_v7 = vand.u32 4294901760, %v237_v53  ;;  %v3574_v8 = vand.u32 4294901760, %v148_v59  ;;  %v249_v12 = vsub.f32 %v3534_v46, %v5359_v57  ;;  %v142_v57 = vld [vmem:[#allocation6 + $0xc8] sm:$0xff] }
  0x25   :  { %162 = vmatpush.msra.mxu0 %v3476_v17  ;;  %215 = vmatpush.msra.mxu1 %v214_v43  ;;  %v3580_v13 = vand.u32 4294901760, %v118_v61  ;;  %v5357_v18 = vand.u32 4294901760, %v3558_v58  ;;  %v3584_v26 = vsub.f32 %v120_v48, %v3554_v56  ;;  %v3588_v31 = vand.u32 4294901760, %v117_v2 }
  0x26   :  { %320 = vmatpush.msra.mxu2 %v3485_v21  ;;  %375 = vmatpush.msra.mxu3 %v3476_v17  ;;  %v3590_v32 = vand.u32 4294901760, %v147_v6  ;;  %v244_v36 = vand.u32 4294901760, %v243_v62  ;;  %v255_v37 = vsub.f32 %v3546_v52, %v5358_v0  ;;  %v5356_v38 = vand.u32 4294901760, %v3570_v1 }
  0x27   :  { %164 = vmatpush.msra.mxu0 %v3492_v25  ;;  %221 = vmatpush.msra.mxu1 %v220_v49  ;;  %5404 = vst [vmem:[#allocation17_spill] sm:$0xff] %v3588_v31  ;;  %v3598_v39 = vsub.f32 %v119_v54, %v3566_v63  ;;  %v3603_v42 = vsub.f32 %v148_v59, %v3574_v8  ;;  %v3605_v43 = vand.u32 4294901760, %v146_v30  ;;  %v250_v47 = vand.u32 4294901760, %v249_v12  ;;  %v144_v59 = vld [vmem:[#allocation6 + $0xd8] sm:$0xff]  ;;  %v143_v12 = vld [vmem:[#allocation6 + $0xd0] sm:$0xff] }
  0x28   :  { %323 = vmatpush.msra.mxu2 %v3499_v29  ;;  %377 = vmatpush.msra.mxu3 %v3492_v25  ;;  %v261_v48 = vsub.f32 %v3558_v58, %v5357_v18  ;;  %v5360_v49 = vand.u32 4294901760, %v3584_v26  ;;  %v3613_v53 = vsub.f32 %v118_v61, %v3580_v13  ;;  %v3618_v54 = vsub.f32 %v117_v2, %v3588_v31 }
  0x29   :  { %166 = vmatpush.msra.mxu0 %v3496_v28  ;;  %227 = vmatpush.msra.mxu1 %v226_v55  ;;  %v3621_v55 = vsub.f32 %v147_v6, %v3590_v32  ;;  %v267_v61 = vsub.f32 %v3570_v1, %v5356_v38  ;;  %v5363_v62 = vand.u32 4294901760, %v3598_v39  ;;  %v5366_v2 = vand.u32 4294901760, %v3603_v42 }
  0x2a   :  { %326 = vmatpush.msra.mxu2 %v3523_v40  ;;  %379 = vmatpush.msra.mxu3 %v3496_v28  ;;  %v3634_v6 = vsub.f32 %v146_v30, %v3605_v43  ;;  %v5367_v38 = vand.u32 4294901760, %v3613_v53  ;;  %v3641_v18 = vand.u32 4294901760, %v144_v59  ;;  %v5370_v30 = vand.u32 4294901760, %v3618_v54 }
  0x2b   :  { %168 = vmatpush.msra.mxu0 %v3514_v34  ;;  %233 = vmatpush.msra.mxu1 %v232_v60  ;;  %v256_v60 = vand.u32 4294901760, %v255_v37  ;;  %v273_v37 = vsub.f32 %v3584_v26, %v5360_v49  ;;  %v5371_v0 = vand.u32 4294901760, %v3621_v55  ;;  %v3654_v51 = vand.u32 4294901760, %v143_v12 }
  0x2c   :  { %329 = vmatpush.msra.mxu2 %v3534_v46  ;;  %381 = vmatpush.msra.mxu3 %v3514_v34  ;;  %v573_v41 = vsub.f32 %v3603_v42, %v5366_v2  ;;  %v3667_v35 = vsub.f32 %v144_v59, %v3641_v18  ;;  %v3669_v33 = vand.u32 4294901760, %v142_v57  ;;  %v291_v2 = vsub.f32 %v3618_v54, %v5370_v30 }
  0x2d   :  { %170 = vmatpush.msra.mxu0 %v3531_v45  ;;  %239 = vmatpush.msra.mxu1 %v238_v7  ;;  %v3628_v7 = vand.u32 4294901760, %v145_v44  ;;  %v3682_v27 = vsub.f32 %v143_v12, %v3654_v51  ;;  %v5405_v14 = vand.u32 4294901760, %v3470_v15  ;;  %v5407_v15 = vand.u32 4294901760, %v3474_v16 }
  0x2e   :  { %332 = vmatpush.msra.mxu2 %v3546_v52  ;;  %383 = vmatpush.msra.mxu3 %v3531_v45  ;;  %v574_v30 = vand.u32 4294901760, %v573_v41  ;;  %v5409_v16 = vand.u32 4294901760, %v3479_v19 }
  0x2f   :  { %172 = vmatpush.msra.mxu0 %v3542_v50  ;;  %245 = vmatpush.msra.mxu1 %v244_v36  ;;  %v262_v36 = vand.u32 4294901760, %v261_v48  ;;  %v279_v48 = vsub.f32 %v3598_v39, %v5363_v62  ;;  %v3652_v49 = vsub.f32 %v145_v44, %v3628_v7  ;;  %v274_v62 = vand.u32 4294901760, %v273_v37  ;;  %v140_v37 = vld [vmem:[#allocation6 + $0xb8] sm:$0xff] }
  0x30   :  { %335 = vmatpush.msra.mxu2 %v3558_v58  ;;  %385 = vmatpush.msra.mxu3 %v3542_v50  ;;  %v285_v44 = vsub.f32 %v3613_v53, %v5367_v38  ;;  %v3697_v38 = vand.u32 4294901760, %v140_v37 }
  0x31   :  { %174 = vmatpush.msra.mxu0 %v3554_v56  ;;  %251 = vmatpush.msra.mxu1 %v250_v47  ;;  %v268_v47 = vand.u32 4294901760, %v267_v61  ;;  %v141_v61 = vld [vmem:[#allocation6 + $0xc0] sm:$0xff]  ;;  %v280_v59 = vand.u32 4294901760, %v279_v48  ;;  %v3695_v48 = vsub.f32 %v142_v57, %v3669_v33  ;;  %v138_v57 = vld [vmem:[#allocation6 + $0xa8] sm:$0xff] }
  0x32   :  { %338 = vmatpush.msra.mxu2 %v3570_v1  ;;  %387 = vmatpush.msra.mxu3 %v3554_v56  ;;  %v3684_v24 = vand.u32 4294901760, %v141_v61  ;;  %v3737_v19 = vand.u32 4294901760, %v138_v57 }
  0x33   :  { %176 = vmatpush.msra.mxu0 %v3566_v63  ;;  %257 = vmatpush.msra.mxu1 %v256_v60  ;;  %v5373_v60 = vand.u32 4294901760, %v3634_v6 }
  0x34   :  { %341 = vmatpush.msra.mxu2 %v3584_v26  ;;  %389 = vmatpush.msra.mxu3 %v3566_v63  ;;  %v3708_v12 = vsub.f32 %v141_v61, %v3684_v24 }
  0x35   :  { %178 = vmatpush.msra.mxu0 %v3580_v13  ;;  %263 = vmatpush.msra.mxu1 %v262_v36  ;;  %v579_v36 = vsub.f32 %v3621_v55, %v5371_v0  ;;  %v585_v0 = vsub.f32 %v3634_v6, %v5373_v60  ;;  %v113_v60 = vld [vmem:[#allocation3] sm:$0xff] }
  0x36   :  { %344 = vmatpush.msra.mxu2 %v3598_v39  ;;  %391 = vmatpush.msra.mxu3 %v3580_v13  ;;  %v3722_v61 = vand.u32 4294901760, %v113_v60 }
  0x37   :  { %180 = vmatpush.msra.mxu0 %v3588_v31  ;;  %269 = vmatpush.msra.mxu1 %v268_v47  ;;  %v286_v47 = vand.u32 4294901760, %v285_v44  ;;  %v580_v41 = vand.u32 4294901760, %v579_v36  ;;  %v5408_v36 = vand.u32 4294901760, %v3667_v35 }
  0x38   :  { %347 = vmatpush.msra.mxu2 %v3613_v53  ;;  %393 = vmatpush.msra.mxu3 %v3588_v31  ;;  %v3710_v31 = vand.u32 4294901760, %v139_v23 }
  0x39   :  { %410 = vmatpush.msrb.mxu0 %v200_v22  ;;  %275 = vmatpush.msra.mxu1 %v274_v62  ;;  %v292_v22 = vand.u32 4294901760, %v291_v2  ;;  %v5406_v62 = vand.u32 4294901760, %v3652_v49  ;;  %v586_v2 = vand.u32 4294901760, %v585_v0 }
  0x3a   :  { %350 = vmatpush.msra.mxu2 %v3618_v54  ;;  %575 = vmatpush.msrb.mxu3 %v574_v30  ;;  %v5410_v30 = vand.u32 4294901760, %v3682_v27 }
  0x3b   :  { %414 = vmatpush.msrb.mxu0 %v5405_v14  ;;  %281 = vmatpush.msra.mxu1 %v280_v59  ;;  %v591_v44 = vsub.f32 %v3652_v49, %v5406_v62  ;;  %v597_v59 = vsub.f32 %v3667_v35, %v5408_v36  ;;  %v3720_v62 = vsub.f32 %v140_v37, %v3697_v38  ;;  %v137_v36 = vld [vmem:[#allocation6 + $0xa0] sm:$0xff]  ;;  %v5411_v14 = vand.u32 4294901760, %v3482_v20 }
  0x3c   :  { %522 = vmatpush.msrb.mxu2 %v3574_v8  ;;  %581 = vmatpush.msrb.mxu3 %v580_v41  ;;  %v3732_v37 = vsub.f32 %v139_v23, %v3710_v31  ;;  %v5412_v41 = vand.u32 4294901760, %v3695_v48  ;;  %v3745_v23 = vsub.f32 %v113_v60, %v3722_v61  ;;  %v5413_v20 = vand.u32 4294901760, %v3485_v21 }
  0x3d   :  { %418 = vmatpush.msrb.mxu0 %v5407_v15  ;;  %287 = vmatpush.msra.mxu1 %v286_v47  ;;  %v592_v0 = vand.u32 4294901760, %v591_v44  ;;  %v603_v47 = vsub.f32 %v3682_v27, %v5410_v30  ;;  %v5376_v15 = vand.u32 4294901760, %v3708_v12  ;;  %v136_v30 = vld [vmem:[#allocation6 + $0x98] sm:$0xff]  ;;  %v5414_v60 = vand.u32 4294901760, %v3499_v29  ;;  %v114_v29 = vld [vmem:[#allocation3 + $0x8] sm:$0xff] }
  0x3e   :  { %524 = vmatpush.msrb.mxu2 %v3590_v32  ;;  %587 = vmatpush.msrb.mxu3 %v586_v2  ;;  %v609_v44 = vsub.f32 %v3695_v48, %v5412_v41  ;;  %v3761_v21 = vsub.f32 %v138_v57, %v3737_v19  ;;  %v135_v41 = vld [vmem:[#allocation6 + $0x90] sm:$0xff] }
  0x3f   :  { %422 = vmatpush.msrb.mxu0 %v5409_v16  ;;  %293 = vmatpush.msra.mxu1 %v292_v22  ;;  %v598_v22 = vand.u32 4294901760, %v597_v59  ;;  %v5375_v16 = vand.u32 4294901760, %v3720_v62  ;;  %v604_v2 = vand.u32 4294901760, %v603_v47  ;;  %v615_v59 = vsub.f32 %v3708_v12, %v5376_v15 }
  0x40   :  { %526 = vmatpush.msrb.mxu2 %v3605_v43  ;;  %593 = vmatpush.msrb.mxu3 %v592_v0  ;;  %v610_v0 = vand.u32 4294901760, %v609_v44  ;;  %v3780_v44 = vand.u32 4294901760, %v135_v41  ;;  %v5416_v15 = vand.u32 4294901760, %v3534_v46 }
  0x41   :  { %426 = vmatpush.msrb.mxu0 %v5411_v14  ;;  %481 = vmatpush.msrb.mxu1 %v3453_v3  ;;  %v3750_v3 = vand.u32 4294901760, %v137_v36  ;;  %v5377_v14 = vand.u32 4294901760, %v3732_v37  ;;  %v621_v47 = vsub.f32 %v3720_v62, %v5375_v16  ;;  %v616_v57 = vand.u32 4294901760, %v615_v59  ;;  %v134_v16 = vld [vmem:[#allocation6 + $0x88] sm:$0xff] }
  0x42   :  { %528 = vmatpush.msrb.mxu2 %v3628_v7  ;;  %599 = vmatpush.msrb.mxu3 %v598_v22  ;;  %v3797_v46 = vand.u32 4294901760, %v134_v16 }
  0x43   :  { %430 = vmatpush.msrb.mxu0 %v5413_v20  ;;  %483 = vmatpush.msrb.mxu1 %v3455_v4  ;;  %v3763_v4 = vand.u32 4294901760, %v136_v30  ;;  %v183_v20 = vand.u32 4294901760, %v3745_v23  ;;  %v627_v22 = vsub.f32 %v3732_v37, %v5377_v14  ;;  %v5417_v14 = vand.u32 4294901760, %v3546_v52 }
  0x44   :  { %530 = vmatpush.msrb.mxu2 %v3641_v18  ;;  %605 = vmatpush.msrb.mxu3 %v604_v2  ;;  %v622_v2 = vand.u32 4294901760, %v621_v47 }
  0x45   :  { %434 = vmatpush.msrb.mxu0 %v5414_v60  ;;  %485 = vmatpush.msrb.mxu1 %v3457_v5  ;;  %v5415_v60 = vand.u32 4294901760, %v3523_v40  ;;  %v3774_v5 = vsub.f32 %v137_v36, %v3750_v3  ;;  %v3787_v40 = vsub.f32 %v136_v30, %v3763_v4  ;;  %v3789_v36 = vand.u32 4294901760, %v114_v29 }
  0x46   :  { %532 = vmatpush.msrb.mxu2 %v3654_v51  ;;  %611 = vmatpush.msrb.mxu3 %v610_v0  ;;  %v184_v59 = vsub.f32 %v3745_v23, %v183_v20  ;;  %v3801_v30 = vsub.f32 %v135_v41, %v3780_v44  ;;  %v5418_v0 = vand.u32 4294901760, %v3558_v58  ;;  %v3821_v58 = vsub.f32 %v134_v16, %v3797_v46 }
  0x47   :  { %438 = vmatpush.msrb.mxu0 %v5415_v60  ;;  %487 = vmatpush.msrb.mxu1 %v3459_v9  ;;  %v632_v9 = vand.u32 4294901760, %v3761_v21  ;;  %v133_v60 = vld [vmem:[#allocation6 + $0x80] sm:$0xff]  ;;  %v644_v52 = vand.u32 4294901760, %v3787_v40 }
  0x48   :  { %534 = vmatpush.msrb.mxu2 %v3669_v33  ;;  %617 = vmatpush.msrb.mxu3 %v616_v57  ;;  %v3811_v47 = vand.u32 4294901760, %v133_v60  ;;  %v185_v41 = vand.u32 4294901760, %v184_v59  ;;  %v5419_v57 = vand.u32 4294901760, %v3570_v1 }
  0x49   :  { %442 = vmatpush.msrb.mxu0 %v5416_v15  ;;  %489 = vmatpush.msrb.mxu1 %v3461_v10  ;;  %v638_v10 = vand.u32 4294901760, %v3774_v5  ;;  %v628_v15 = vand.u32 4294901760, %v627_v22  ;;  %v115_v22 = vld [vmem:[#allocation3 + $0x1] sm:$0xff] }
  0x4a   :  { %536 = vmatpush.msrb.mxu2 %v3684_v24  ;;  %623 = vmatpush.msrb.mxu3 %v622_v2  ;;  %v5420_v2 = vand.u32 4294901760, %v3584_v26  ;;  %v3832_v16 = vsub.f32 %v133_v60, %v3811_v47  ;;  %v5421_v26 = vand.u32 4294901760, %v3598_v39  ;;  %v5422_v39 = vand.u32 4294901760, %v3613_v53 }
  0x4b   :  { %446 = vmatpush.msrb.mxu0 %v5417_v14  ;;  %491 = vmatpush.msrb.mxu1 %v3463_v11  ;;  %v633_v11 = vsub.f32 %v3761_v21, %v632_v9  ;;  %v190_v14 = vsub.f32 %v114_v29, %v3789_v36  ;;  %v650_v29 = vand.u32 4294901760, %v3801_v30 }
  0x4c   :  { %538 = vmatpush.msrb.mxu2 %v3697_v38  ;;  %629 = vmatpush.msrb.mxu3 %v628_v15 }
  0x4d   :  { %450 = vmatpush.msrb.mxu0 %v5418_v0  ;;  %493 = vmatpush.msrb.mxu1 %v3476_v17  ;;  %v639_v17 = vsub.f32 %v3774_v5, %v638_v10  ;;  %v634_v1 = vand.u32 4294901760, %v633_v11  ;;  %v191_v59 = vand.u32 4294901760, %v190_v14  ;;  %v651_v60 = vsub.f32 %v3801_v30, %v650_v29 }
  0x4e   :  { %540 = vmatpush.msrb.mxu2 %v3710_v31  ;;  %186 = vmatmul.f32.vlgmr.msra.gmra.mxu0 %v185_v41 }
  0x4f   :  { %454 = vmatpush.msrb.mxu0 %v5419_v57  ;;  %495 = vmatpush.msrb.mxu1 %v3492_v25  ;;  %v645_v25 = vsub.f32 %v3787_v40, %v644_v52  ;;  %v640_v15 = vand.u32 4294901760, %v639_v17  ;;  %v192_v11 = vsub.f32 %v190_v14, %v191_v59  ;;  %v5423_v57 = vand.u32 4294901760, %v3618_v54 }
  0x50   :  { %353 = vmatmul.f32.vlgmr.msra.gmra.mxu2 %v3745_v23  ;;  %v3835_v23 = vand.u32 4294901760, %v115_v22  ;;  %397 = vmatmul.f32.vlgmr.msra.gmra.mxu3 %v183_v20  ;;  %v662_v20 = vand.u32 4294901760, %v3832_v16  ;;  %v652_v17 = vand.u32 4294901760, %v651_v60 }
  0x51   :  { %458 = vmatpush.msrb.mxu0 %v5420_v2  ;;  %497 = vmatpush.msrb.mxu1 %v3496_v28  ;;  %v656_v28 = vand.u32 4294901760, %v3821_v58  ;;  %v646_v0 = vand.u32 4294901760, %v645_v25 }
  0x52   :  { %542 = vmatpush.msrb.mxu2 %v3737_v19  ;;  %635 = vmatpush.msrb.mxu3 %v634_v1  ;;  %v663_v53 = vsub.f32 %v3832_v16, %v662_v20 }
  0x53   :  { %462 = vmatpush.msrb.mxu0 %v5421_v26  ;;  %499 = vmatpush.msrb.mxu1 %v3514_v34  ;;  %v3851_v34 = vsub.f32 %v115_v22, %v3835_v23  ;;  %v657_v41 = vsub.f32 %v3821_v58, %v656_v28  ;;  %v116_v22 = vld [vmem:[#allocation3 + $0x9] sm:$0xff]  ;;  %v5426_v26 = vld [vmem:[#allocation17_spill] sm:$0xff] }
  0x54   :  { %544 = vmatpush.msrb.mxu2 %v3750_v3  ;;  %295 = vmatmul.f32.vlgmr.msra.gmra.mxu1 %v3722_v61  ;;  %v3869_v54 = vand.u32 4294901760, %v116_v22  ;;  %v664_v1 = vand.u32 4294901760, %v663_v53 }
  0x55   :  { %466 = vmatpush.msrb.mxu0 %v5422_v39  ;;  %501 = vmatpush.msrb.mxu1 %v3531_v45  ;;  %v193_v45 = vand.u32 4294901760, %v192_v11  ;;  %v555_v2 = vand.u32 4294901760, %v3851_v34 }
  0x56   :  { %546 = vmatpush.msrb.mxu2 %v3763_v4  ;;  %641 = vmatpush.msrb.mxu3 %v640_v15  ;;  %v3881_v25 = vsub.f32 %v116_v22, %v3869_v54  ;;  %v5427_v15 = vand.u32 4294901760, %v3634_v6 }
  0x57   :  { %470 = vmatpush.msrb.mxu0 %v5423_v57  ;;  %503 = vmatpush.msrb.mxu1 %v3542_v50  ;;  %v658_v50 = vand.u32 4294901760, %v657_v41  ;;  %v909_v57 = vld [vmem:[#allocation9 + $0x38] sm:$0xff] }
  0x58   :  { %548 = vmatpush.msrb.mxu2 %v3780_v44  ;;  %647 = vmatpush.msrb.mxu3 %v646_v0  ;;  %v910_v0 = vld [vmem:[#allocation9 + $0x40] sm:$0xff]  ;;  %v4084_v22 = vand.u32 4294901760, %v909_v57 }
  0x59   :  { %677 = vmatpush.msra.mxu0 %v3603_v42  ;;  %358 = vmatmul.f32.gmra.mxu2 %v190_v14  ;;  %v556_v14 = vsub.f32 %v3851_v34, %v555_v2 }
  0x5a   :  { %505 = vmatpush.msrb.mxu1 %v3554_v56  ;;  %550 = vmatpush.msrb.mxu2 %v3797_v46  ;;  %v5424_v56 = vand.u32 4294901760, %v3603_v42  ;;  %v563_v42 = vand.u32 4294901760, %v3881_v25 }
  0x5b   :  { %653 = vmatpush.msrb.mxu3 %v652_v17  ;;  %680 = vmatpush.msra.mxu0 %v3621_v55 }
  0x5c   :  { %194 = vmatmul.f32.gmra.mxu0 %v193_v45  ;;  %403 = vmatmul.f32.gmra.mxu3 %v191_v59  ;;  %v557_v59 = vand.u32 4294901760, %v556_v14 }
  0x5d   :  { %507 = vmatpush.msrb.mxu1 %v3566_v63  ;;  %552 = vmatpush.msrb.mxu2 %v3811_v47  ;;  %v5425_v63 = vand.u32 4294901760, %v3621_v55  ;;  %v5429_v55 = vand.u32 4294901760, %v3667_v35 }
  0x5e   :  { %659 = vmatpush.msrb.mxu3 %v658_v50  ;;  %683 = vmatpush.msra.mxu0 %v3634_v6  ;;  %v908_v50 = vld [vmem:[#allocation9 + $0x30] sm:$0xff] }
  0x5f   :  { %782 = vmatpush.msra.mxu2 %v5424_v56  ;;  %299 = vmatmul.f32.gmra.mxu1 %v3789_v36  ;;  %v4099_v56 = vsub.f32 %v909_v57, %v4084_v22 }
  0x60   :  { %509 = vmatpush.msrb.mxu1 %v3580_v13  ;;  %665 = vmatpush.msrb.mxu3 %v664_v1  ;;  %v5428_v13 = vand.u32 4294901760, %v3652_v49 }
  0x61   :  { %686 = vmatpush.msra.mxu0 %v3652_v49  ;;  %786 = vmatpush.msra.mxu2 %v5425_v63  ;;  %v5430_v49 = vand.u32 4294901760, %v3682_v27  ;;  %5436 = vst [vmem:[#allocation18_spill] sm:$0xff] %v4099_v56  ;;  %v907_v63 = vld [vmem:[#allocation9 + $0x28] sm:$0xff] }
  0x62   :  { %853 = vmatpush.msra.mxu3 %v3574_v8  ;;  %511 = vmatpush.msrb.mxu1 %v5426_v26 }
  0x63   :  { %689 = vmatpush.msra.mxu0 %v3667_v35  ;;  %790 = vmatpush.msra.mxu2 %v5427_v15  ;;  %v5431_v35 = vand.u32 4294901760, %v3695_v48  ;;  %v4113_v15 = vand.u32 4294901760, %v907_v63 }
  0x64   :  { %735 = vmatpush.msra.mxu1 %v3574_v8  ;;  %855 = vmatpush.msra.mxu3 %v3590_v32  ;;  %v564_v8 = vsub.f32 %v3881_v25, %v563_v42 }
  0x65   :  { %558 = vmatmul.f32.vlgmr.msrb.gmra.mxu2 %v557_v59  ;;  %692 = vmatpush.msra.mxu0 %v3682_v27  ;;  %v5433_v27 = vand.u32 4294901760, %v3720_v62 }
  0x66   :  { %737 = vmatpush.msra.mxu1 %v3590_v32  ;;  %794 = vmatpush.msra.mxu2 %v5428_v13  ;;  %v565_v32 = vand.u32 4294901760, %v564_v8  ;;  %v906_v8 = vld [vmem:[#allocation9 + $0x20] sm:$0xff] }
  0x67   :  { %857 = vmatpush.msra.mxu3 %v3605_v43  ;;  %472 = vmatmul.f32.vlgmr.msrb.gmra.mxu0 %v3722_v61 }
  0x68   :  { %667 = vmatmul.f32.vlgmr.msrb.gmra.mxu3 %v3835_v23  ;;  %695 = vmatpush.msra.mxu0 %v3695_v48 }
  0x69   :  { %739 = vmatpush.msra.mxu1 %v3605_v43  ;;  %798 = vmatpush.msra.mxu2 %v5429_v55  ;;  %v5432_v43 = vand.u32 4294901760, %v3708_v12 }
  0x6a   :  { %859 = vmatpush.msra.mxu3 %v3628_v7  ;;  %513 = vmatmul.f32.vlgmr.msrb.gmra.mxu1 %v3722_v61 }
  0x6b   :  { %698 = vmatpush.msra.mxu0 %v3708_v12  ;;  %741 = vmatpush.msra.mxu1 %v3628_v7  ;;  %v915_v7 = vld [vmem:[#allocation9 + $0x68] sm:$0xff] }
  0x6c   :  { %802 = vmatpush.msra.mxu2 %v5430_v49  ;;  %861 = vmatpush.msra.mxu3 %v3641_v18  ;;  %v3996_v48 = vand.u32 4294901760, %v915_v7  ;;  %v4127_v49 = vsub.f32 %v907_v63, %v4113_v15  ;;  %v902_v63 = vld [vmem:[#allocation9] sm:$0xff] }
  0x6d   :  { %701 = vmatpush.msra.mxu0 %v3720_v62  ;;  %743 = vmatpush.msra.mxu1 %v3641_v18  ;;  %v916_v18 = vld [vmem:[#allocation9 + $0x70] sm:$0xff]  ;;  %v914_v62 = vld [vmem:[#allocation9 + $0x60] sm:$0xff] }
  0x6e   :  { %806 = vmatpush.msra.mxu2 %v5431_v35  ;;  %863 = vmatpush.msra.mxu3 %v3654_v51  ;;  %5438 = vst [vmem:[#allocation20_spill] sm:$0xff] %v4127_v49  ;;  %v4129_v35 = vand.u32 4294901760, %v906_v8 }
  0x6f   :  { %566 = vmatmul.f32.gmra.mxu2 %v565_v32  ;;  %704 = vmatpush.msra.mxu0 %v3732_v37 }
  0x70   :  { %745 = vmatpush.msra.mxu1 %v3654_v51  ;;  %810 = vmatpush.msra.mxu2 %v5432_v43  ;;  %v5434_v51 = vand.u32 4294901760, %v3732_v37 }
  0x71   :  { %865 = vmatpush.msra.mxu3 %v3669_v33  ;;  %476 = vmatmul.f32.gmra.mxu0 %v3789_v36 }
  0x72   :  { %671 = vmatmul.f32.gmra.mxu3 %v3869_v54  ;;  %707 = vmatpush.msra.mxu0 %v3761_v21  ;;  %v913_v21 = vld [vmem:[#allocation9 + $0x58] sm:$0xff] }
  0x73   :  { %747 = vmatpush.msra.mxu1 %v3669_v33  ;;  %814 = vmatpush.msra.mxu2 %v5433_v27  ;;  %v905_v27 = vld [vmem:[#allocation9 + $0x18] sm:$0xff] }
  0x74   :  { %867 = vmatpush.msra.mxu3 %v3684_v24  ;;  %517 = vmatmul.f32.gmra.mxu1 %v3789_v36  ;;  %v912_v36 = vld [vmem:[#allocation9 + $0x50] sm:$0xff] }
  0x75   :  { %710 = vmatpush.msra.mxu0 %v3774_v5  ;;  %749 = vmatpush.msra.mxu1 %v3684_v24  ;;  %v917_v24 = vld [vmem:[#allocation9 + $0x78] sm:$0xff] }
  0x76   :  { %818 = vmatpush.msra.mxu2 %v5434_v51  ;;  %869 = vmatpush.msra.mxu3 %v3697_v38  ;;  %v3980_v33 = vand.u32 4294901760, %v917_v24 }
  0x77   :  { %713 = vmatpush.msra.mxu0 %v3787_v40  ;;  %751 = vmatpush.msra.mxu1 %v3697_v38  ;;  %v3985_v38 = vand.u32 4294901760, %v916_v18  ;;  %v4025_v40 = vand.u32 4294901760, %v913_v21 }
  0x78   :  { %822 = vmatpush.msra.mxu2 %v632_v9  ;;  %871 = vmatpush.msra.mxu3 %v3710_v31 }
  0x79   :  { %716 = vmatpush.msra.mxu0 %v3801_v30  ;;  %753 = vmatpush.msra.mxu1 %v3710_v31  ;;  %v3983_v31 = vsub.f32 %v917_v24, %v3980_v33  ;;  %v3993_v12 = vsub.f32 %v916_v18, %v3985_v38  ;;  %v4141_v24 = vand.u32 4294901760, %v4127_v49  ;;  %v4144_v18 = vsub.f32 %v906_v8, %v4129_v35 }
  0x7a   :  { %826 = vmatpush.msra.mxu2 %v638_v10  ;;  %873 = vmatpush.msra.mxu3 %v3737_v19 }
  0x7b   :  { %719 = vmatpush.msra.mxu0 %v3821_v58  ;;  %755 = vmatpush.msra.mxu1 %v3737_v19  ;;  %v3990_v6 = vand.u32 4294901760, %v3983_v31  ;;  %v4003_v37 = vand.u32 4294901760, %v3993_v12  ;;  %v4006_v19 = vsub.f32 %v915_v7, %v3996_v48  ;;  %v911_v58 = vld [vmem:[#allocation9 + $0x48] sm:$0xff]  ;;  %5439 = vst [vmem:[#allocation21_spill] sm:$0xff] %v4144_v18  ;;  %v4146_v7 = vand.u32 4294901760, %v905_v27 }
  0x7c   :  { %830 = vmatpush.msra.mxu2 %v644_v52  ;;  %875 = vmatpush.msra.mxu3 %v3750_v3  ;;  %v4037_v52 = vand.u32 4294901760, %v912_v36 }
  0x7d   :  { %722 = vmatpush.msra.mxu0 %v3832_v16  ;;  %757 = vmatpush.msra.mxu1 %v3750_v3  ;;  %v962_v61 = vsub.f32 %v3983_v31, %v3990_v6  ;;  %v4009_v3 = vand.u32 4294901760, %v914_v62  ;;  %v968_v5 = vsub.f32 %v3993_v12, %v4003_v37 }
  0x7e   :  { %834 = vmatpush.msra.mxu2 %v650_v29  ;;  %877 = vmatpush.msra.mxu3 %v3763_v4 }
  0x7f   :  { %725 = vmatmul.f32.vlgmr.msra.gmra.mxu0 %v3851_v34  ;;  %759 = vmatpush.msra.mxu1 %v3763_v4  ;;  %v4013_v4 = vand.u32 4294901760, %v962_v61  ;;  %v4021_v9 = vsub.f32 %v914_v62, %v4009_v3  ;;  %v4029_v10 = vand.u32 4294901760, %v968_v5  ;;  %v4068_v34 = vand.u32 4294901760, %v910_v0  ;;  %v904_v61 = vld [vmem:[#allocation9 + $0x10] sm:$0xff] }
  0x80   :  { %838 = vmatpush.msra.mxu2 %v656_v28  ;;  %879 = vmatpush.msra.mxu3 %v3780_v44  ;;  %v4052_v28 = vand.u32 4294901760, %v911_v58  ;;  %v1022_v5 = vsub.f32 %v4127_v49, %v4141_v24 }
  0x81   :  { %761 = vmatpush.msra.mxu1 %v3780_v44  ;;  %919 = vmatpush.msrb.mxu0 %v3980_v33  ;;  %v4018_v44 = vand.u32 4294901760, %v4006_v19  ;;  %v4034_v30 = vand.u32 4294901760, %v4021_v9  ;;  %v4082_v53 = vsub.f32 %v910_v0, %v4068_v34  ;;  %v903_v0 = vld [vmem:[#allocation9 + $0x8] sm:$0xff] }
  0x82   :  { %842 = vmatpush.msra.mxu2 %v662_v20  ;;  %881 = vmatpush.msra.mxu3 %v3797_v46  ;;  %v4066_v39 = vsub.f32 %v911_v58, %v4052_v28  ;;  %v4164_v58 = vand.u32 4294901760, %v904_v61 }
  0x83   :  { %844 = vmatmul.f32.vlgmr.msra.gmra.mxu2 %v3835_v23  ;;  %763 = vmatpush.msra.mxu1 %v3797_v46  ;;  %v974_v46 = vsub.f32 %v4006_v19, %v4018_v44  ;;  %v980_v16 = vsub.f32 %v4021_v9, %v4034_v30  ;;  %5435 = vst [vmem:[#allocation17_spill] sm:$0xff] %v4082_v53  ;;  %v4096_v14 = vand.u32 4294901760, %v4082_v53 }
  0x84   :  { %883 = vmatpush.msra.mxu3 %v3811_v47  ;;  %1062 = vmatpush.msrb.mxu2 %v3983_v31  ;;  %v4079_v45 = vand.u32 4294901760, %v4066_v39 }
  0x85   :  { %885 = vmatmul.f32.vlgmr.msra.gmra.mxu3 %v3835_v23  ;;  %765 = vmatpush.msra.mxu1 %v3811_v47  ;;  %v4040_v47 = vsub.f32 %v913_v21, %v4025_v40  ;;  %v4045_v29 = vand.u32 4294901760, %v974_v46  ;;  %v4050_v23 = vsub.f32 %v912_v36, %v4037_v52  ;;  %v4060_v11 = vand.u32 4294901760, %v980_v16 }
  0x86   :  { %769 = vmatmul.f32.vlgmr.msra.gmra.mxu1 %v555_v2  ;;  %1115 = vmatpush.msrb.mxu3 %v3980_v33  ;;  %v998_v1 = vsub.f32 %v4066_v39, %v4079_v45  ;;  %v1004_v26 = vsub.f32 %v4082_v53, %v4096_v14  ;;  %v4159_v36 = vand.u32 4294901760, %v4144_v18  ;;  %v4162_v46 = vsub.f32 %v905_v27, %v4146_v7 }
  0x87   :  { %730 = vmatmul.f32.gmra.mxu0 %v3881_v25  ;;  %1065 = vmatpush.msrb.mxu2 %v3993_v12  ;;  %v4055_v60 = vand.u32 4294901760, %v4040_v47  ;;  %v4063_v20 = vand.u32 4294901760, %v4050_v23  ;;  %v4104_v25 = vand.u32 4294901760, %v908_v50  ;;  %v4195_v27 = vand.u32 4294901760, %v902_v63 }
  0x88   :  { %1117 = vmatpush.msrb.mxu3 %v3985_v38  ;;  %921 = vmatpush.msrb.mxu0 %v3985_v38  ;;  %v4106_v59 = vand.u32 4294901760, %v998_v1  ;;  %v4122_v55 = vand.u32 4294901760, %v1004_v26  ;;  %5440 = vst [vmem:[#allocation22_spill] sm:$0xff] %v4162_v46  ;;  %v1028_v57 = vsub.f32 %v4144_v18, %v4159_v36  ;;  %v4186_v1 = vand.u32 4294901760, %v903_v0 }
  0x89   :  { %1068 = vmatpush.msrb.mxu2 %v4006_v19  ;;  %964 = vmatpush.msrb.mxu1 %v4013_v4  ;;  %v986_v41 = vsub.f32 %v4040_v47, %v4055_v60  ;;  %v992_v17 = vsub.f32 %v4050_v23, %v4063_v20  ;;  %v4119_v13 = vsub.f32 %v908_v50, %v4104_v25 }
  0x8a   :  { %1119 = vmatpush.msrb.mxu3 %v3996_v48  ;;  %923 = vmatpush.msrb.mxu0 %v3996_v48  ;;  %v4180_v50 = vsub.f32 %v904_v61, %v4164_v58  ;;  %v4188_v26 = vand.u32 4294901760, %v1028_v57 }
  0x8b   :  { %848 = vmatmul.f32.gmra.mxu2 %v3869_v54  ;;  %970 = vmatpush.msrb.mxu1 %v4029_v10  ;;  %v4087_v2 = vand.u32 4294901760, %v986_v41  ;;  %5437 = vst [vmem:[#allocation19_spill] sm:$0xff] %v4119_v13  ;;  %v4135_v43 = vand.u32 4294901760, %v4119_v13  ;;  %v4172_v41 = vand.u32 4294901760, %v1022_v5 }
  0x8c   :  { %1121 = vmatpush.msrb.mxu3 %v4009_v3  ;;  %925 = vmatpush.msrb.mxu0 %v4009_v3  ;;  %5441 = vst [vmem:[#allocation23_spill] sm:$0xff] %v4180_v50 }
  0x8d   :  { %889 = vmatmul.f32.gmra.mxu3 %v3869_v54  ;;  %1071 = vmatpush.msrb.mxu2 %v4021_v9  ;;  %v4091_v54 = vand.u32 4294901760, %v992_v17  ;;  %v1016_v62 = vsub.f32 %v4119_v13, %v4135_v43  ;;  %v4177_v17 = vand.u32 4294901760, %v4162_v46 }
  0x8e   :  { %775 = vmatmul.f32.gmra.mxu1 %v563_v42  ;;  %1123 = vmatpush.msrb.mxu3 %v4025_v40  ;;  %v4111_v42 = vand.u32 4294901760, %v4099_v56 }
  0x8f   :  { %927 = vmatpush.msrb.mxu0 %v4025_v40  ;;  %1074 = vmatpush.msrb.mxu2 %v4040_v47  ;;  %v4169_v16 = vand.u32 4294901760, %v1016_v62  ;;  %v1034_v8 = vsub.f32 %v4162_v46, %v4177_v17  ;;  %v4201_v62 = vsub.f32 %v903_v0, %v4186_v1 }
  0x90   :  { %1125 = vmatpush.msrb.mxu3 %v4037_v52  ;;  %976 = vmatpush.msrb.mxu1 %v4045_v29  ;;  %v1010_v32 = vsub.f32 %v4099_v56, %v4111_v42 }
  0x91   :  { %929 = vmatpush.msrb.mxu0 %v4037_v52  ;;  %1077 = vmatpush.msrb.mxu2 %v4050_v23  ;;  %v4204_v5 = vand.u32 4294901760, %v1034_v8  ;;  %v4215_v0 = vand.u32 4294901760, %v4201_v62 }
  0x92   :  { %1127 = vmatpush.msrb.mxu3 %v4052_v28  ;;  %982 = vmatpush.msrb.mxu1 %v4060_v11  ;;  %v4138_v51 = vand.u32 4294901760, %v1010_v32  ;;  %v4193_v32 = vand.u32 4294901760, %v4180_v50 }
  0x93   :  { %931 = vmatpush.msrb.mxu0 %v4052_v28  ;;  %1080 = vmatpush.msrb.mxu2 %v4066_v39 }
  0x94   :  { %1129 = vmatpush.msrb.mxu3 %v4068_v34  ;;  %988 = vmatpush.msrb.mxu1 %v4087_v2  ;;  %v1040_v57 = vsub.f32 %v4180_v50, %v4193_v32 }
  0x95   :  { %933 = vmatpush.msrb.mxu0 %v4068_v34  ;;  %1083 = vmatpush.msrb.mxu2 %v4082_v53 }
  0x96   :  { %1131 = vmatpush.msrb.mxu3 %v4084_v22  ;;  %994 = vmatpush.msrb.mxu1 %v4091_v54 }
  0x97   :  { %935 = vmatpush.msrb.mxu0 %v4084_v22  ;;  %1086 = vmatpush.msrb.mxu2 %v4099_v56 }
  0x98   :  { %1133 = vmatpush.msrb.mxu3 %v4104_v25  ;;  %1000 = vmatpush.msrb.mxu1 %v4106_v59 }
  0x99   :  { %937 = vmatpush.msrb.mxu0 %v4104_v25  ;;  %1089 = vmatpush.msrb.mxu2 %v4119_v13 }
  0x9a   :  { %1135 = vmatpush.msrb.mxu3 %v4113_v15  ;;  %1006 = vmatpush.msrb.mxu1 %v4122_v55 }
  0x9b   :  { %939 = vmatpush.msrb.mxu0 %v4113_v15  ;;  %1092 = vmatpush.msrb.mxu2 %v4127_v49 }
  0x9c   :  { %1137 = vmatpush.msrb.mxu3 %v4129_v35  ;;  %1012 = vmatpush.msrb.mxu1 %v4138_v51 }
  0x9d   :  { %941 = vmatpush.msrb.mxu0 %v4129_v35  ;;  %1095 = vmatpush.msrb.mxu2 %v4144_v18  ;;  %v4218_v18 = vand.u32 4294901760, %v1040_v57 }
  0x9e   :  { %1139 = vmatpush.msrb.mxu3 %v4146_v7  ;;  %1018 = vmatpush.msrb.mxu1 %v4169_v16 }
  0x9f   :  { %943 = vmatpush.msrb.mxu0 %v4146_v7  ;;  %1098 = vmatpush.msrb.mxu2 %v4162_v46  ;;  %v4209_v46 = vsub.f32 %v902_v63, %v4195_v27 }
  0xa0   :  { %1141 = vmatpush.msrb.mxu3 %v4164_v58  ;;  %1024 = vmatpush.msrb.mxu1 %v4172_v41 }
  0xa1   :  { %945 = vmatpush.msrb.mxu0 %v4164_v58  ;;  %1101 = vmatpush.msrb.mxu2 %v4180_v50  ;;  %v4221_v8 = vand.u32 4294901760, %v4209_v46  ;;  %v1046_v50 = vsub.f32 %v4201_v62, %v4215_v0 }
  0xa2   :  { %1143 = vmatpush.msrb.mxu3 %v4186_v1  ;;  %1030 = vmatpush.msrb.mxu1 %v4188_v26 }
  0xa3   :  { %947 = vmatpush.msrb.mxu0 %v4186_v1  ;;  %1104 = vmatpush.msrb.mxu2 %v4201_v62  ;;  %v1052_v57 = vsub.f32 %v4209_v46, %v4221_v8  ;;  %v4234_v56 = vand.u32 4294901760, %v1046_v50 }
  0xa4   :  { %1145 = vmatpush.msrb.mxu3 %v4195_v27  ;;  %1036 = vmatpush.msrb.mxu1 %v4204_v5 }
  0xa5   :  { %949 = vmatpush.msrb.mxu0 %v4195_v27  ;;  %1107 = vmatpush.msrb.mxu2 %v4209_v46  ;;  %v4237_v53 = vand.u32 4294901760, %v1052_v57 }
  0xa6   :  { %1314 = vmatpush.msra.mxu3 %v4013_v4  ;;  %1042 = vmatpush.msrb.mxu1 %v4218_v18 }
  0xa7   :  { %1269 = vmatpush.msra.mxu2 %v3980_v33  ;;  %1156 = vmatpush.msra.mxu0 %v3990_v6 }
  0xa8   :  { %1320 = vmatpush.msra.mxu3 %v4029_v10  ;;  %1048 = vmatpush.msrb.mxu1 %v4234_v56 }
  0xa9   :  { %1271 = vmatpush.msra.mxu2 %v3985_v38  ;;  %1160 = vmatpush.msra.mxu0 %v4003_v37 }
  0xaa   :  { %1326 = vmatpush.msra.mxu3 %v4045_v29  ;;  %1054 = vmatpush.msrb.mxu1 %v4237_v53 }
  0xab   :  { %1273 = vmatpush.msra.mxu2 %v3996_v48  ;;  %1164 = vmatpush.msra.mxu0 %v4018_v44 }
  0xac   :  { %1223 = vmatpush.msra.mxu1 %v3980_v33  ;;  %1332 = vmatpush.msra.mxu3 %v4060_v11 }
  0xad   :  { %1275 = vmatpush.msra.mxu2 %v4009_v3  ;;  %1168 = vmatpush.msra.mxu0 %v4034_v30 }
  0xae   :  { %1225 = vmatpush.msra.mxu1 %v3985_v38  ;;  %1338 = vmatpush.msra.mxu3 %v4087_v2 }
  0xaf   :  { %1277 = vmatpush.msra.mxu2 %v4025_v40  ;;  %1172 = vmatpush.msra.mxu0 %v4055_v60 }
  0xb0   :  { %1227 = vmatpush.msra.mxu1 %v3996_v48  ;;  %1344 = vmatpush.msra.mxu3 %v4091_v54 }
  0xb1   :  { %1279 = vmatpush.msra.mxu2 %v4037_v52  ;;  %1176 = vmatpush.msra.mxu0 %v4063_v20 }
  0xb2   :  { %1229 = vmatpush.msra.mxu1 %v4009_v3  ;;  %1350 = vmatpush.msra.mxu3 %v4106_v59 }
  0xb3   :  { %1281 = vmatpush.msra.mxu2 %v4052_v28  ;;  %1180 = vmatpush.msra.mxu0 %v4079_v45 }
  0xb4   :  { %1231 = vmatpush.msra.mxu1 %v4025_v40  ;;  %1356 = vmatpush.msra.mxu3 %v4122_v55 }
  0xb5   :  { %1283 = vmatpush.msra.mxu2 %v4068_v34  ;;  %1184 = vmatpush.msra.mxu0 %v4096_v14 }
  0xb6   :  { %1233 = vmatpush.msra.mxu1 %v4037_v52  ;;  %1362 = vmatpush.msra.mxu3 %v4138_v51 }
  0xb7   :  { %1285 = vmatpush.msra.mxu2 %v4084_v22  ;;  %1188 = vmatpush.msra.mxu0 %v4111_v42 }
  0xb8   :  { %1235 = vmatpush.msra.mxu1 %v4052_v28  ;;  %1368 = vmatpush.msra.mxu3 %v4169_v16 }
  0xb9   :  { %1287 = vmatpush.msra.mxu2 %v4104_v25  ;;  %1192 = vmatpush.msra.mxu0 %v4135_v43 }
  0xba   :  { %1237 = vmatpush.msra.mxu1 %v4068_v34  ;;  %1374 = vmatpush.msra.mxu3 %v4172_v41 }
  0xbb   :  { %1289 = vmatpush.msra.mxu2 %v4113_v15  ;;  %1196 = vmatpush.msra.mxu0 %v4141_v24 }
  0xbc   :  { %1239 = vmatpush.msra.mxu1 %v4084_v22  ;;  %1380 = vmatpush.msra.mxu3 %v4188_v26 }
  0xbd   :  { %1291 = vmatpush.msra.mxu2 %v4129_v35  ;;  %1200 = vmatpush.msra.mxu0 %v4159_v36 }
  0xbe   :  { %1241 = vmatpush.msra.mxu1 %v4104_v25  ;;  %1386 = vmatpush.msra.mxu3 %v4204_v5 }
  0xbf   :  { %1293 = vmatpush.msra.mxu2 %v4146_v7  ;;  %1204 = vmatpush.msra.mxu0 %v4177_v17 }
  0xc0   :  { %1243 = vmatpush.msra.mxu1 %v4113_v15  ;;  %1392 = vmatpush.msra.mxu3 %v4218_v18 }
  0xc1   :  { %1295 = vmatpush.msra.mxu2 %v4164_v58  ;;  %1208 = vmatpush.msra.mxu0 %v4193_v32 }
  0xc2   :  { %1245 = vmatpush.msra.mxu1 %v4129_v35  ;;  %1398 = vmatpush.msra.mxu3 %v4234_v56 }
  0xc3   :  { %1297 = vmatpush.msra.mxu2 %v4186_v1  ;;  %1212 = vmatpush.msra.mxu0 %v4215_v0 }
  0xc4   :  { %1247 = vmatpush.msra.mxu1 %v4146_v7  ;;  %1404 = vmatpush.msra.mxu3 %v4237_v53 }
  0xc5   :  { %1299 = vmatpush.msra.mxu2 %v4195_v27  ;;  %1216 = vmatpush.msra.mxu0 %v4221_v8 }
  0xc6   :  { %1249 = vmatpush.msra.mxu1 %v4164_v58 }
  0xc8   :  { %1251 = vmatpush.msra.mxu1 %v4186_v1 }
  0xca   :  { %1253 = vmatpush.msra.mxu1 %v4195_v27 }
  0xcb   :  { %v4154_v21 = vpop.f32.mrf.mxu0 }
  0xd1   :  { %v296_v61 = vpop.f32.mrf.mxu1 }
  0xd2   :  { %v297_v10 = vadd.f32 %v296_v61, %v4154_v21 }
  0xd3   :  { %v354_v63 = vpop.f32.mrf.mxu2  ;;  %v398_v13 = vpop.f32.mrf.mxu3 }
  0xd4   :  { %v355_v11 = vadd.f32 %v354_v63, %v297_v10 }
  0xd6   :  { %v399_v54 = vadd.f32 %v398_v13, %v355_v11 }
  0xd9   :  { %v195_v49 = vpop.f32.mrf.mxu0 }
  0xdc   :  { %v300_v4 = vpop.f32.mrf.mxu1  ;;  %v359_v29 = vpop.f32.mrf.mxu2 }
  0xdd   :  { %v301_v2 = vadd.f32 %v300_v4, %v195_v49 }
  0xdf   :  { %v404_v57 = vpop.f32.mrf.mxu3  ;;  %v360_v59 = vadd.f32 %v359_v29, %v301_v2 }
  0xe1   :  { %v405_v51 = vadd.f32 %v404_v57, %v360_v59 }
  0xe4   :  { %v473_v50 = vpop.f32.mrf.mxu0 }
  0xe5   :  { %v474_v13 = vadd.f32 %v473_v50, %v399_v54 }
  0xe7   :  { %v514_v21 = vpop.f32.mrf.mxu1 }
  0xe8   :  { %v559_v49 = vpop.f32.mrf.mxu2  ;;  %v515_v16 = vadd.f32 %v514_v21, %v474_v13 }
  0xea   :  { %v560_v26 = vadd.f32 %v559_v49, %v515_v16 }
  0xeb   :  { %v668_v61 = vpop.f32.mrf.mxu3 }
  0xec   :  { %v669_v18 = vadd.f32 %v668_v61, %v560_v26  ;;  %v4303_v61 = vld [vmem:[#allocation11] sm:$0xff] }
  0xee   :  { %v477_v55 = vpop.f32.mrf.mxu0 }
  0xef   :  { %v478_v63 = vadd.f32 %v477_v55, %v405_v51 }
  0xf1   :  { %v518_v41 = vpop.f32.mrf.mxu1 }
  0xf2   :  { %v567_v10 = vpop.f32.mrf.mxu2  ;;  %v519_v5 = vadd.f32 %v518_v41, %v478_v63  ;;  %v4305_v63 = vld [vmem:[#allocation11 + $0x8] sm:$0xff] }
  0xf4   :  { %v568_v56 = vadd.f32 %v567_v10, %v519_v5 }
  0xf5   :  { %v672_v29 = vpop.f32.mrf.mxu3 }
  0xf6   :  { %v673_v21 = vadd.f32 %v672_v29, %v568_v56 }
  0xfc   :  { %v726_v4 = vpop.f32.mrf.mxu0 }
  0xfd   :  { %v727_v50 = vadd.f32 %v726_v4, %v669_v18 }
 0x103   :  { %v770_v57 = vpop.f32.mrf.mxu1 }
 0x104   :  { %v771_v11 = vadd.f32 %v770_v57, %v727_v50  ;;  %v731_v54 = vpop.f32.mrf.mxu0 }
 0x105   :  { %v732_v13 = vadd.f32 %v731_v54, %v673_v21 }
 0x106   :  { %v845_v2 = vpop.f32.mrf.mxu2 }
 0x107   :  { %v846_v49 = vadd.f32 %v845_v2, %v771_v11 }
 0x108   :  { %v886_v59 = vpop.f32.mrf.mxu3 }
 0x109   :  { %v887_v51 = vadd.f32 %v886_v59, %v846_v49 }
 0x10b   :  { %v776_v53 = vpop.f32.mrf.mxu1  ;;  %v4308_v4 = vmul.f32 %v887_v51, %v4303_v61 }
 0x10c   :  { %v777_v55 = vadd.f32 %v776_v53, %v732_v13 }
 0x10d   :  { %v1259_v29 = vmul.f32 %v4308_v4, %v4308_v4 }
 0x10e   :  { %v849_v16 = vpop.f32.mrf.mxu2 }
 0x10f   :  { %v850_v41 = vadd.f32 %v849_v16, %v777_v55 }
 0x110   :  { %v890_v26 = vpop.f32.mrf.mxu3 }
 0x111   :  { %v891_v10 = vadd.f32 %v890_v26, %v850_v41 }
 0x113   :  { %v4311_v5 = vmul.f32 %v891_v10, %v4305_v63 }
 0x115   :  { %v895_v18 = vadd.f32 %v4311_v5, %v4308_v4  ;;  %v1260_v50 = vmul.f32 %v4311_v5, %v4311_v5 }
 0x117   :  { %v896_v57 = vrot.slane %v895_v18, 4  ;;  %v1261_v56 = vadd.f32 %v1260_v50, %v1259_v29 }
 0x119   :  { %v897_v11 = vadd.f32 %v896_v57, %v895_v18  ;;  %v1262_v2 = vrot.slane %v1261_v56, 4 }
 0x11b   :  { %v898_v54 = vrot.slane %v897_v11, 2  ;;  %v1263_v21 = vadd.f32 %v1262_v2, %v1261_v56 }
 0x11d   :  { %v899_v59 = vadd.f32 %v898_v54, %v897_v11  ;;  %v1264_v49 = vrot.slane %v1263_v21, 2 }
 0x11f   :  { %v1265_v13 = vadd.f32 %v1264_v49, %v1263_v21  ;;  %v900_v53 = vrot.slane %v899_v59, 1 }
 0x121   :  { %v1266_v55 = vrot.slane %v1265_v13, 1  ;;  %v901_v51 = vadd.f32 %v900_v53, %v899_v59 }
 0x123   :  { %v950_v16 = vand.u32 4294901760, %v901_v51  ;;  %v1267_v41 = vadd.f32 %v1266_v55, %v1265_v13  ;;  %v1656_v13 = vld [vmem:[#allocation8 + $0x38] sm:$0xff] }
 0x125   :  { %1056 = vmatmul.f32.vlgmr.msrb.gmra.mxu1 %v950_v16  ;;  %v951_v26 = vsub.f32 %v901_v51, %v950_v16  ;;  %v4319_v10 = vand.u32 4294901760, %v1267_v41  ;;  %v4475_v51 = vand.u32 4294901760, %v1656_v13 }
 0x126   :  { %1465 = vmatpush.msrb.mxu1 %v3980_v33 }
 0x127   :  { %1110 = vmatmul.f32.vlgmr.msrb.gmra.mxu2 %v951_v26  ;;  %v952_v29 = vand.u32 4294901760, %v951_v26  ;;  %v4323_v18 = vsub.f32 %v1267_v41, %v4319_v10 }
 0x128   :  { %1467 = vmatpush.msrb.mxu1 %v3985_v38  ;;  %1506 = vmatpush.msrb.mxu2 %v3990_v6 }
 0x129   :  { %1149 = vmatmul.f32.vlgmr.msrb.gmra.mxu3 %v952_v29  ;;  %v953_v50 = vsub.f32 %v951_v26, %v952_v29  ;;  %v1302_v57 = vand.u32 4294901760, %v4323_v18  ;;  %v1655_v26 = vld [vmem:[#allocation8 + $0x30] sm:$0xff] }
 0x12a   :  { %1469 = vmatpush.msrb.mxu1 %v3996_v48  ;;  %1510 = vmatpush.msrb.mxu2 %v4003_v37  ;;  %v5447_v37 = vld [vmem:[#allocation22_spill] sm:$0xff] }
 0x12b   :  { %1573 = vmatpush.msrb.mxu3 %v3980_v33  ;;  %v954_v56 = vand.u32 4294901760, %v953_v50  ;;  %v1303_v11 = vsub.f32 %v4323_v18, %v1302_v57  ;;  %v5442_v33 = vld [vmem:[#allocation17_spill] sm:$0xff]  ;;  %v4490_v50 = vand.u32 4294901760, %v1655_v26 }
 0x12c   :  { %1471 = vmatpush.msrb.mxu1 %v4009_v3  ;;  %1514 = vmatpush.msrb.mxu2 %v4018_v44 }
 0x12d   :  { %1575 = vmatpush.msrb.mxu3 %v3985_v38  ;;  %955 = vmatmul.f32.vlgmr.msrb.gmra.mxu0 %v954_v56  ;;  %v1304_v6 = vand.u32 4294901760, %v1303_v11  ;;  %v5444_v38 = vld [vmem:[#allocation19_spill] sm:$0xff]  ;;  %v1654_v56 = vld [vmem:[#allocation8 + $0x28] sm:$0xff] }
 0x12e   :  { %1255 = vmatmul.f32.vlgmr.msra.gmra.mxu1 %v950_v16  ;;  %1412 = vmatpush.msrb.mxu0 %v3983_v31  ;;  %v5443_v31 = vld [vmem:[#allocation18_spill] sm:$0xff] }
 0x12f   :  { %1473 = vmatpush.msrb.mxu1 %v4025_v40  ;;  %1518 = vmatpush.msrb.mxu2 %v4034_v30 }
 0x130   :  { %1577 = vmatpush.msrb.mxu3 %v3996_v48  ;;  %1305 = vmatmul.f32.vlgmr.msra.gmra.mxu2 %v1304_v6  ;;  %v5446_v48 = vld [vmem:[#allocation21_spill] sm:$0xff] }
 0x131   :  { %1415 = vmatpush.msrb.mxu0 %v3993_v12  ;;  %1475 = vmatpush.msrb.mxu1 %v4037_v52  ;;  %v5445_v12 = vld [vmem:[#allocation20_spill] sm:$0xff] }
 0x132   :  { %1522 = vmatpush.msrb.mxu2 %v4055_v60  ;;  %1579 = vmatpush.msrb.mxu3 %v4009_v3  ;;  %v1664_v3 = vld [vmem:[#allocation8 + $0x78] sm:$0xff]  ;;  %v1661_v60 = vld [vmem:[#allocation8 + $0x60] sm:$0xff] }
 0x133   :  { %1406 = vmatmul.f32.vlgmr.msra.gmra.mxu3 %v4319_v10  ;;  %1418 = vmatpush.msrb.mxu0 %v4006_v19  ;;  %v5448_v19 = vld [vmem:[#allocation23_spill] sm:$0xff]  ;;  %v4394_v44 = vand.u32 4294901760, %v1664_v3 }
 0x134   :  { %1477 = vmatpush.msrb.mxu1 %v4052_v28  ;;  %1526 = vmatpush.msrb.mxu2 %v4063_v20 }
 0x135   :  { %1581 = vmatpush.msrb.mxu3 %v4025_v40  ;;  %1421 = vmatpush.msrb.mxu0 %v4021_v9  ;;  %v1663_v9 = vld [vmem:[#allocation8 + $0x70] sm:$0xff]  ;;  %v4397_v40 = vsub.f32 %v1664_v3, %v4394_v44 }
 0x136   :  { %1479 = vmatpush.msrb.mxu1 %v4068_v34  ;;  %1530 = vmatpush.msrb.mxu2 %v4079_v45  ;;  %v4399_v30 = vand.u32 4294901760, %v1663_v9  ;;  %v4420_v45 = vand.u32 4294901760, %v1661_v60 }
 0x137   :  { %1583 = vmatpush.msrb.mxu3 %v4037_v52  ;;  %1218 = vmatmul.f32.vlgmr.msra.gmra.mxu0 %v950_v16  ;;  %v1662_v52 = vld [vmem:[#allocation8 + $0x68] sm:$0xff] }
 0x138   :  { %1424 = vmatpush.msrb.mxu0 %v4040_v47  ;;  %1481 = vmatpush.msrb.mxu1 %v4084_v22  ;;  %v1732_v47 = vand.u32 4294901760, %v4397_v40 }
 0x139   :  { %1534 = vmatpush.msrb.mxu2 %v4096_v14  ;;  %1585 = vmatpush.msrb.mxu3 %v4052_v28  ;;  %v4408_v28 = vand.u32 4294901760, %v1662_v52 }
 0x13a   :  { %1427 = vmatpush.msrb.mxu0 %v4050_v23  ;;  %1483 = vmatpush.msrb.mxu1 %v4104_v25  ;;  %v4405_v23 = vsub.f32 %v1663_v9, %v4399_v30  ;;  %v1733_v20 = vsub.f32 %v4397_v40, %v1732_v47 }
 0x13b   :  { %1538 = vmatpush.msrb.mxu2 %v4111_v42  ;;  %1587 = vmatpush.msrb.mxu3 %v4068_v34  ;;  %v4417_v34 = vsub.f32 %v1662_v52, %v4408_v28  ;;  %v1652_v52 = vld [vmem:[#allocation8 + $0x18] sm:$0xff] }
 0x13c   :  { %1430 = vmatpush.msrb.mxu0 %v4066_v39  ;;  %1485 = vmatpush.msrb.mxu1 %v4113_v15  ;;  %v1738_v39 = vand.u32 4294901760, %v4405_v23  ;;  %v1734_v14 = vand.u32 4294901760, %v1733_v20  ;;  %v4518_v20 = vand.u32 4294901760, %v1652_v52 }
 0x13d   :  { %1542 = vmatpush.msrb.mxu2 %v4135_v43  ;;  %1589 = vmatpush.msrb.mxu3 %v4084_v22  ;;  %v1660_v22 = vld [vmem:[#allocation8 + $0x58] sm:$0xff]  ;;  %v1744_v42 = vand.u32 4294901760, %v4417_v34  ;;  %v1659_v43 = vld [vmem:[#allocation8 + $0x50] sm:$0xff] }
 0x13e   :  { %1433 = vmatpush.msrb.mxu0 %v5442_v33  ;;  %1487 = vmatpush.msrb.mxu1 %v4129_v35 }
 0x13f   :  { %1546 = vmatpush.msrb.mxu2 %v4141_v24  ;;  %1591 = vmatpush.msrb.mxu3 %v4104_v25  ;;  %v1739_v25 = vsub.f32 %v4405_v23, %v1738_v39 }
 0x140   :  { %1436 = vmatpush.msrb.mxu0 %v5443_v31  ;;  %1489 = vmatpush.msrb.mxu1 %v4146_v7  ;;  %v4501_v31 = vsub.f32 %v1655_v26, %v4490_v50 }
 0x141   :  { %1550 = vmatpush.msrb.mxu2 %v4159_v36  ;;  %1593 = vmatpush.msrb.mxu3 %v4113_v15  ;;  %v4429_v15 = vsub.f32 %v1661_v60, %v4420_v45  ;;  %v1740_v24 = vand.u32 4294901760, %v1739_v25 }
 0x142   :  { %1439 = vmatpush.msrb.mxu0 %v5444_v38  ;;  %1491 = vmatpush.msrb.mxu1 %v4164_v58  ;;  %v4504_v38 = vand.u32 4294901760, %v1654_v56 }
 0x143   :  { %1554 = vmatpush.msrb.mxu2 %v4177_v17  ;;  %1595 = vmatpush.msrb.mxu3 %v4129_v35  ;;  %v4433_v35 = vand.u32 4294901760, %v1660_v22  ;;  %v1750_v36 = vand.u32 4294901760, %v4429_v15  ;;  %v1658_v17 = vld [vmem:[#allocation8 + $0x48] sm:$0xff] }
 0x144   :  { %1442 = vmatpush.msrb.mxu0 %v5445_v12  ;;  %1493 = vmatpush.msrb.mxu1 %v4186_v1  ;;  %v1653_v12 = vld [vmem:[#allocation8 + $0x20] sm:$0xff]  ;;  %v4513_v3 = vsub.f32 %v1654_v56, %v4504_v38 }
 0x145   :  { %1558 = vmatpush.msrb.mxu2 %v4193_v32  ;;  %1597 = vmatpush.msrb.mxu3 %v4146_v7  ;;  %v1745_v7 = vsub.f32 %v4417_v34, %v1744_v42  ;;  %v1751_v32 = vsub.f32 %v4429_v15, %v1750_v36  ;;  %v4516_v9 = vand.u32 4294901760, %v1653_v12 }
 0x146   :  { %1445 = vmatpush.msrb.mxu0 %v5446_v48  ;;  %1495 = vmatpush.msrb.mxu1 %v4195_v27  ;;  %v5390_v25 = vand.u32 4294901760, %v4513_v3 }
 0x147   :  { %1562 = vmatpush.msrb.mxu2 %v4215_v0  ;;  %1599 = vmatpush.msrb.mxu3 %v4164_v58  ;;  %v4444_v58 = vand.u32 4294901760, %v1659_v43  ;;  %v1752_v2 = vand.u32 4294901760, %v1751_v32 }
 0x148   :  { %1499 = vmatmul.f32.vlgmr.msrb.gmra.mxu1 %v1302_v57  ;;  %1448 = vmatpush.msrb.mxu0 %v5447_v37 }
 0x149   :  { %1566 = vmatpush.msrb.mxu2 %v4221_v8  ;;  %1601 = vmatpush.msrb.mxu3 %v4186_v1  ;;  %v1746_v1 = vand.u32 4294901760, %v1745_v7  ;;  %v4455_v0 = vsub.f32 %v1659_v43, %v4444_v58  ;;  %v1657_v8 = vld [vmem:[#allocation8 + $0x40] sm:$0xff]  ;;  %v4527_v43 = vsub.f32 %v1653_v12, %v4516_v9  ;;  %v4531_v7 = vsub.f32 %v1652_v52, %v4518_v20 }
 0x14a   :  { %1568 = vmatmul.f32.vlgmr.msrb.gmra.mxu2 %v4319_v10  ;;  %1451 = vmatpush.msrb.mxu0 %v5448_v19  ;;  %v4462_v21 = vand.u32 4294901760, %v1657_v8  ;;  %v1786_v19 = vand.u32 4294901760, %v4501_v31 }
 0x14b   :  { %1603 = vmatpush.msrb.mxu3 %v4195_v27  ;;  %1837 = vmatpush.msra.mxu2 %v4397_v40  ;;  %v4451_v27 = vand.u32 4294901760, %v1658_v17  ;;  %v1762_v49 = vand.u32 4294901760, %v4455_v0 }
 0x14c   :  { %1605 = vmatmul.f32.vlgmr.msrb.gmra.mxu3 %v4319_v10  ;;  %1454 = vmatpush.msrb.mxu0 %v4201_v62  ;;  %v4473_v55 = vsub.f32 %v1657_v8, %v4462_v21  ;;  %v1793_v8 = vsub.f32 %v4513_v3, %v5390_v25  ;;  %v1677_v25 = vld [vmem:[#allocation8 + $0xe0] sm:$0xff] }
 0x14d   :  { %1895 = vmatpush.msra.mxu3 %v4394_v44  ;;  %1840 = vmatpush.msra.mxu2 %v4405_v23  ;;  %v4460_v54 = vsub.f32 %v1658_v17, %v4451_v27  ;;  %v1763_v41 = vsub.f32 %v4455_v0, %v1762_v49 }
 0x14e   :  { %1457 = vmatpush.msrb.mxu0 %v4209_v46  ;;  %1735 = vmatpush.msra.mxu1 %v1734_v14  ;;  %v4442_v46 = vsub.f32 %v1660_v22, %v4433_v35  ;;  %v1774_v29 = vand.u32 4294901760, %v4473_v55  ;;  %v1787_v14 = vsub.f32 %v4501_v31, %v1786_v19  ;;  %v1794_v56 = vand.u32 4294901760, %v1793_v8 }
 0x14f   :  { %1460 = vmatmul.f32.vlgmr.msrb.gmra.mxu0 %v4323_v18  ;;  %1897 = vmatpush.msra.mxu3 %v4399_v30  ;;  %v1768_v53 = vand.u32 4294901760, %v4460_v54  ;;  %v4488_v18 = vsub.f32 %v1656_v13, %v4475_v51  ;;  %v1764_v57 = vand.u32 4294901760, %v1763_v41  ;;  %v5387_v13 = vand.u32 4294901760, %v4531_v7 }
 0x150   :  { %1682 = vmatpush.msra.mxu0 %v4394_v44  ;;  %1843 = vmatpush.msra.mxu2 %v4417_v34  ;;  %v1756_v62 = vand.u32 4294901760, %v4442_v46  ;;  %v1775_v6 = vsub.f32 %v4473_v55, %v1774_v29  ;;  %v1788_v32 = vand.u32 4294901760, %v1787_v14 }
 0x151   :  { %1899 = vmatpush.msra.mxu3 %v4408_v28  ;;  %1741 = vmatpush.msra.mxu1 %v1740_v24  ;;  %v1769_v10 = vsub.f32 %v4460_v54, %v1768_v53  ;;  %v1780_v33 = vand.u32 4294901760, %v4488_v18  ;;  %v1651_v24 = vld [vmem:[#allocation8 + $0x10] sm:$0xff]  ;;  %v1805_v12 = vsub.f32 %v4531_v7, %v5387_v13 }
 0x152   :  { %1684 = vmatpush.msra.mxu0 %v4399_v30  ;;  %1846 = vmatpush.msra.mxu2 %v4429_v15  ;;  %v1757_v59 = vsub.f32 %v4442_v46, %v1756_v62  ;;  %v1776_v48 = vand.u32 4294901760, %v1775_v6  ;;  %v4533_v17 = vand.u32 4294901760, %v1651_v24  ;;  %v1649_v6 = vld [vmem:[#allocation8] sm:$0xff]  ;;  %v1675_v15 = vld [vmem:[#allocation8 + $0xd0] sm:$0xff] }
 0x153   :  { %1901 = vmatpush.msra.mxu3 %v4420_v45  ;;  %1747 = vmatpush.msra.mxu1 %v1746_v1  ;;  %v1770_v11 = vand.u32 4294901760, %v1769_v10  ;;  %v1781_v37 = vsub.f32 %v4488_v18, %v1780_v33  ;;  %v4561_v52 = vand.u32 4294901760, %v1649_v6 }
 0x154   :  { %1686 = vmatpush.msra.mxu0 %v4408_v28  ;;  %1849 = vmatpush.msra.mxu2 %v4442_v46  ;;  %v1758_v16 = vand.u32 4294901760, %v1757_v59  ;;  %v1650_v59 = vld [vmem:[#allocation8 + $0x8] sm:$0xff] }
 0x155   :  { %1903 = vmatpush.msra.mxu3 %v4433_v35  ;;  %1753 = vmatpush.msra.mxu1 %v1752_v2  ;;  %v1782_v60 = vand.u32 4294901760, %v1781_v37  ;;  %v5389_v2 = vand.u32 4294901760, %v4527_v43  ;;  %v4546_v41 = vand.u32 4294901760, %v1650_v59 }
 0x156   :  { %1688 = vmatpush.msra.mxu0 %v4420_v45  ;;  %1852 = vmatpush.msra.mxu2 %v4455_v0 }
 0x157   :  { %1905 = vmatpush.msra.mxu3 %v4444_v58  ;;  %1759 = vmatpush.msra.mxu1 %v1758_v16  ;;  %v4544_v16 = vsub.f32 %v1651_v24, %v4533_v17  ;;  %v4559_v37 = vsub.f32 %v1650_v59, %v4546_v41 }
 0x158   :  { %1690 = vmatpush.msra.mxu0 %v4433_v35  ;;  %1855 = vmatpush.msra.mxu2 %v4460_v54 }
 0x159   :  { %1907 = vmatpush.msra.mxu3 %v4451_v27  ;;  %1765 = vmatpush.msra.mxu1 %v1764_v57  ;;  %v5385_v24 = vand.u32 4294901760, %v4559_v37 }
 0x15a   :  { %1692 = vmatpush.msra.mxu0 %v4444_v58  ;;  %1858 = vmatpush.msra.mxu2 %v4473_v55 }
 0x15b   :  { %1909 = vmatpush.msra.mxu3 %v4462_v21  ;;  %1771 = vmatpush.msra.mxu1 %v1770_v11  ;;  %v1799_v11 = vsub.f32 %v4527_v43, %v5389_v2  ;;  %v1817_v59 = vsub.f32 %v4559_v37, %v5385_v24 }
 0x15c   :  { %1694 = vmatpush.msra.mxu0 %v4451_v27  ;;  %1861 = vmatpush.msra.mxu2 %v4488_v18 }
 0x15d   :  { %1911 = vmatpush.msra.mxu3 %v4475_v51  ;;  %1777 = vmatpush.msra.mxu1 %v1776_v48  ;;  %v5386_v48 = vand.u32 4294901760, %v4544_v16 }
 0x15e   :  { %1696 = vmatpush.msra.mxu0 %v4462_v21  ;;  %1864 = vmatpush.msra.mxu2 %v4501_v31 }
 0x15f   :  { %1913 = vmatpush.msra.mxu3 %v4490_v50  ;;  %1783 = vmatpush.msra.mxu1 %v1782_v60  ;;  %v1800_v60 = vand.u32 4294901760, %v1799_v11  ;;  %v1811_v14 = vsub.f32 %v4544_v16, %v5386_v48  ;;  %v1680_v11 = vld [vmem:[#allocation8 + $0xf8] sm:$0xff] }
 0x160   :  { %1698 = vmatpush.msra.mxu0 %v4475_v51  ;;  %1867 = vmatpush.msra.mxu2 %v4513_v3 }
 0x161   :  { %1915 = vmatpush.msra.mxu3 %v4504_v38  ;;  %1789 = vmatpush.msra.mxu1 %v1788_v32  ;;  %v1812_v8 = vand.u32 4294901760, %v1811_v14 }
 0x162   :  { %1700 = vmatpush.msra.mxu0 %v4490_v50  ;;  %1870 = vmatpush.msra.mxu2 %v4527_v43 }
 0x163   :  { %1917 = vmatpush.msra.mxu3 %v4516_v9  ;;  %1795 = vmatpush.msra.mxu1 %v1794_v56 }
 0x164   :  { %1702 = vmatpush.msra.mxu0 %v4504_v38  ;;  %1873 = vmatpush.msra.mxu2 %v4531_v7 }
 0x165   :  { %1919 = vmatpush.msra.mxu3 %v4518_v20  ;;  %1801 = vmatpush.msra.mxu1 %v1800_v60  ;;  %v1818_v60 = vand.u32 4294901760, %v1817_v59  ;;  %v1678_v59 = vld [vmem:[#allocation8 + $0xe8] sm:$0xff] }
 0x166   :  { %1704 = vmatpush.msra.mxu0 %v4516_v9  ;;  %1876 = vmatpush.msra.mxu2 %v4544_v16 }
 0x167   :  { %1921 = vmatpush.msra.mxu3 %v4533_v17 }
 0x168   :  { %1706 = vmatpush.msra.mxu0 %v4518_v20  ;;  %1879 = vmatpush.msra.mxu2 %v4559_v37 }
 0x169   :  { %1923 = vmatpush.msra.mxu3 %v4546_v41 }
 0x16a   :  { %1708 = vmatpush.msra.mxu0 %v4533_v17 }
 0x16b   :  { %1925 = vmatpush.msra.mxu3 %v4561_v52 }
 0x16c   :  { %1710 = vmatpush.msra.mxu0 %v4546_v41 }
 0x16e   :  { %1712 = vmatpush.msra.mxu0 %v4561_v52 }
 0x170   :  { %1942 = vmatpush.msrb.mxu0 %v1732_v47  ;;  %v4600_v47 = vand.u32 4294901760, %v1678_v59 }
 0x172   :  { %1946 = vmatpush.msrb.mxu0 %v1738_v39 }
 0x174   :  { %1950 = vmatpush.msrb.mxu0 %v1744_v42 }
 0x176   :  { %1954 = vmatpush.msrb.mxu0 %v1750_v36 }
 0x178   :  { %1958 = vmatpush.msrb.mxu0 %v1756_v62  ;;  %v1674_v62 = vld [vmem:[#allocation8 + $0xc8] sm:$0xff] }
 0x17a   :  { %1962 = vmatpush.msrb.mxu0 %v1762_v49  ;;  %v1673_v49 = vld [vmem:[#allocation8 + $0xc0] sm:$0xff] }
 0x17c   :  { %1966 = vmatpush.msrb.mxu0 %v1768_v53  ;;  %v1672_v53 = vld [vmem:[#allocation8 + $0xb8] sm:$0xff] }
 0x17e   :  { %1970 = vmatpush.msrb.mxu0 %v1774_v29  ;;  %v1671_v29 = vld [vmem:[#allocation8 + $0xb0] sm:$0xff] }
 0x180   :  { %1974 = vmatpush.msrb.mxu0 %v1780_v33  ;;  %v1669_v33 = vld [vmem:[#allocation8 + $0xa0] sm:$0xff] }
 0x182   :  { %1978 = vmatpush.msrb.mxu0 %v1786_v19 }
 0x1a2   :  { %v1057_v1 = vpop.f32.mrf.mxu1 }
 0x1aa   :  { %v956_v22 = vpop.f32.mrf.mxu0  ;;  %v1111_v10 = vpop.f32.mrf.mxu2 }
 0x1ab   :  { %v1058_v26 = vadd.f32 %v1057_v1, %v956_v22  ;;  %v1806_v22 = vand.u32 4294901760, %v1805_v12  ;;  %v4571_v1 = vsub.f32 %v1649_v6, %v4561_v52  ;;  %v4583_v12 = vand.u32 4294901760, %v1680_v11  ;;  %v1256_v14 = vpop.f32.mrf.mxu1 }
 0x1ac   :  { %v1150_v57 = vpop.f32.mrf.mxu3 }
 0x1ad   :  { %v1112_v32 = vadd.f32 %v1111_v10, %v1058_v26  ;;  %v5388_v56 = vand.u32 4294901760, %v4571_v1  ;;  %1807 = vmatpush.msra.mxu1 %v1806_v22  ;;  %1882 = vmatpush.msra.mxu2 %v4571_v1  ;;  %v1679_v10 = vld [vmem:[#allocation8 + $0xf0] sm:$0xff]  ;;  %v4592_v24 = vsub.f32 %v1680_v11, %v4583_v12 }
 0x1ae   :  { %v4594_v22 = vand.u32 4294901760, %v1679_v10 }
 0x1af   :  { %v1823_v26 = vsub.f32 %v4571_v1, %v5388_v56  ;;  %1813 = vmatpush.msra.mxu1 %v1812_v8  ;;  %2054 = vmatpush.msrb.mxu2 %v4583_v12  ;;  %v1151_v48 = vadd.f32 %v1150_v57, %v1112_v32  ;;  %v2104_v40 = vand.u32 4294901760, %v4592_v24  ;;  %v4612_v57 = vand.u32 4294901760, %v1677_v25 }
 0x1b0   :  { %v4603_v8 = vsub.f32 %v1679_v10, %v4594_v22  ;;  %v4615_v32 = vsub.f32 %v1678_v59, %v4600_v47 }
 0x1b1   :  { %v1824_v13 = vand.u32 4294901760, %v1823_v26  ;;  %1819 = vmatpush.msra.mxu1 %v1818_v60  ;;  %2056 = vmatpush.msrb.mxu2 %v4594_v22  ;;  %v2105_v23 = vsub.f32 %v4592_v24, %v2104_v40 }
 0x1b2   :  { %v2110_v39 = vand.u32 4294901760, %v4603_v8 }
 0x1b3   :  { %v1306_v56 = vpop.f32.mrf.mxu2  ;;  %1825 = vmatpush.msra.mxu1 %v1824_v13  ;;  %2058 = vmatpush.msrb.mxu2 %v4600_v47  ;;  %v2106_v42 = vand.u32 4294901760, %v2105_v23 }
 0x1b4   :  { %v1219_v6 = vpop.f32.mrf.mxu0  ;;  %v2111_v13 = vsub.f32 %v4603_v8, %v2110_v39 }
 0x1b5   :  { %v1220_v11 = vadd.f32 %v1219_v6, %v1151_v48  ;;  %2013 = vmatpush.msrb.mxu1 %v4394_v44  ;;  %v1676_v48 = vld [vmem:[#allocation8 + $0xd8] sm:$0xff]  ;;  %2060 = vmatpush.msrb.mxu2 %v4612_v57  ;;  %v2116_v6 = vand.u32 4294901760, %v4615_v32  ;;  %v4629_v44 = vsub.f32 %v1677_v25, %v4612_v57 }
 0x1b6   :  { %v1407_v2 = vpop.f32.mrf.mxu3  ;;  %v4625_v26 = vand.u32 4294901760, %v1676_v48  ;;  %2107 = vmatpush.msrb.mxu3 %v2106_v42 }
 0x1b7   :  { %v1408_v60 = vadd.f32 %v1407_v2, %v1306_v56  ;;  %v1257_v10 = vadd.f32 %v1256_v14, %v1220_v11  ;;  %2015 = vmatpush.msrb.mxu1 %v4399_v30  ;;  %v2112_v56 = vand.u32 4294901760, %v2111_v13  ;;  %v2117_v59 = vsub.f32 %v4615_v32, %v2116_v6 }
 0x1b8   :  { %2062 = vmatpush.msrb.mxu2 %v4625_v26  ;;  %v4637_v14 = vand.u32 4294901760, %v1675_v15  ;;  %v4640_v30 = vsub.f32 %v1676_v48, %v4625_v26  ;;  %v2122_v46 = vand.u32 4294901760, %v4629_v44 }
 0x1b9   :  { %2017 = vmatpush.msrb.mxu1 %v4408_v28  ;;  %2113 = vmatpush.msrb.mxu3 %v2112_v56  ;;  %v2118_v23 = vand.u32 4294901760, %v2117_v59  ;;  %v4653_v42 = vmul.f32 0.0022222223, %v1257_v10 }
 0x1ba   :  { %2064 = vmatpush.msrb.mxu2 %v4637_v14  ;;  %v4651_v48 = vsub.f32 %v1675_v15, %v4637_v14  ;;  %v2123_v0 = vsub.f32 %v4629_v44, %v2122_v46  ;;  %v4666_v15 = vand.u32 4294901760, %v1673_v49 }
 0x1bb   :  { %2019 = vmatpush.msrb.mxu1 %v4420_v45  ;;  %2119 = vmatpush.msrb.mxu3 %v2118_v23 }
 0x1bc   :  { %v2134_v10 = vand.u32 4294901760, %v4651_v48  ;;  %v2124_v54 = vand.u32 4294901760, %v2123_v0  ;;  %v4685_v55 = vsub.f32 %v1673_v49, %v4666_v15  ;;  %v4691_v0 = vand.u32 4294901760, %v1671_v29 }
 0x1bd   :  { %2021 = vmatpush.msrb.mxu1 %v4433_v35  ;;  %v1611_v35 = vmul.f32 %v4653_v42, %v4653_v42 }
 0x1be   :  { %v2135_v59 = vsub.f32 %v4651_v48, %v2134_v10  ;;  %2125 = vmatpush.msrb.mxu3 %v2124_v54  ;;  %v2146_v49 = vand.u32 4294901760, %v4685_v55 }
 0x1bf   :  { %2023 = vmatpush.msrb.mxu1 %v4444_v58 }
 0x1c0   :  { %v2136_v23 = vand.u32 4294901760, %v2135_v59 }
 0x1c1   :  { %2025 = vmatpush.msrb.mxu1 %v4451_v27  ;;  %v2147_v27 = vsub.f32 %v4685_v55, %v2146_v49 }
 0x1c3   :  { %2027 = vmatpush.msrb.mxu1 %v4462_v21  ;;  %v5449_v21 = vand.u32 4294901760, %v4513_v3 }
 0x1c5   :  { %v1500_v36 = vpop.f32.mrf.mxu1  ;;  %1982 = vmatpush.msrb.mxu0 %v5449_v21  ;;  %2029 = vmatpush.msrb.mxu1 %v4475_v51 }
 0x1c7   :  { %2031 = vmatpush.msrb.mxu1 %v4490_v50 }
 0x1c9   :  { %2033 = vmatpush.msrb.mxu1 %v4504_v38 }
 0x1cb   :  { %2035 = vmatpush.msrb.mxu1 %v4516_v9  ;;  %v5453_v9 = vand.u32 4294901760, %v4559_v37 }
 0x1cc   :  { %v1461_v34 = vpop.f32.mrf.mxu0 }
 0x1cd   :  { %v1462_v2 = vadd.f32 %v1461_v34, %v1408_v60  ;;  %v1569_v11 = vpop.f32.mrf.mxu2  ;;  %v2128_v60 = vand.u32 4294901760, %v4640_v30  ;;  %v4648_v34 = vand.u32 4294901760, %v1674_v62  ;;  %2037 = vmatpush.msrb.mxu1 %v4518_v20 }
 0x1cf   :  { %v1501_v25 = vadd.f32 %v1500_v36, %v1462_v2  ;;  %v1606_v13 = vpop.f32.mrf.mxu3  ;;  %v2129_v2 = vsub.f32 %v4640_v30, %v2128_v60  ;;  %2066 = vmatpush.msrb.mxu2 %v4648_v34  ;;  %v4669_v45 = vsub.f32 %v1674_v62, %v4648_v34  ;;  %2039 = vmatpush.msrb.mxu1 %v4533_v17 }
 0x1d1   :  { %v1570_v28 = vadd.f32 %v1569_v11, %v1501_v25  ;;  %v2130_v56 = vand.u32 4294901760, %v2129_v2  ;;  %2068 = vmatpush.msrb.mxu2 %v4666_v15  ;;  %v2140_v25 = vand.u32 4294901760, %v4669_v45  ;;  %v4679_v11 = vand.u32 4294901760, %v1672_v53  ;;  %v1670_v2 = vld [vmem:[#allocation8 + $0xa8] sm:$0xff]  ;;  %2041 = vmatpush.msrb.mxu1 %v4546_v41 }
 0x1d2   :  { %v4702_v59 = vand.u32 4294901760, %v1670_v2 }
 0x1d3   :  { %v1607_v36 = vadd.f32 %v1606_v13, %v1570_v28  ;;  %v2141_v28 = vsub.f32 %v4669_v45, %v2140_v25  ;;  %2070 = vmatpush.msrb.mxu2 %v4679_v11  ;;  %v4694_v13 = vsub.f32 %v1672_v53, %v4679_v11  ;;  %2131 = vmatpush.msrb.mxu3 %v2130_v56 }
 0x1d4   :  { %v4705_v53 = vsub.f32 %v1671_v29, %v4691_v0  ;;  %v4721_v31 = vsub.f32 %v1670_v2, %v4702_v59  ;;  %v2148_v29 = vand.u32 4294901760, %v2147_v27  ;;  %2043 = vmatpush.msrb.mxu1 %v4561_v52 }
 0x1d5   :  { %v1610_v62 = vmul.f32 0.0022222223, %v1607_v36  ;;  %v2142_v36 = vand.u32 4294901760, %v2141_v28  ;;  %2072 = vmatpush.msrb.mxu2 %v4691_v0  ;;  %v5391_v54 = vand.u32 4294901760, %v4694_v13  ;;  %2137 = vmatpush.msrb.mxu3 %v2136_v23  ;;  %v1668_v23 = vld [vmem:[#allocation8 + $0x98] sm:$0xff]  ;;  %v3371_v28 = vmov 0.0  }
 0x1d6   :  { %1644 = vst [vmem:[#allocation2] sm:$0xff] %v3371_v28  ;;  %v5392_v2 = vand.u32 4294901760, %v4721_v31  ;;  %v4733_v3 = vand.u32 4294901760, %v1668_v23  ;;  %v5451_v28 = vand.u32 4294901760, %v4531_v7  ;;  %v1665_v7 = vld [vmem:[#allocation8 + $0x80] sm:$0xff] }
 0x1d7   :  { %v1612_v58 = vsub.f32 %v1610_v62, %v1611_v35  ;;  %v2153_v56 = vsub.f32 %v4694_v13, %v5391_v54  ;;  %2074 = vmatpush.msrb.mxu2 %v4702_v59  ;;  %v2158_v62 = vand.u32 4294901760, %v4705_v53  ;;  %v4718_v35 = vand.u32 4294901760, %v1669_v33  ;;  %2143 = vmatpush.msrb.mxu3 %v2142_v36  ;;  %v1667_v36 = vld [vmem:[#allocation8 + $0x90] sm:$0xff] }
 0x1d8   :  { %v4746_v21 = vand.u32 4294901760, %v1667_v36 }
 0x1d9   :  { %v1613_v18 = vmax.f32 %v1612_v58, 0.0  ;;  %v2154_v58 = vand.u32 4294901760, %v2153_v56  ;;  %v2159_v54 = vsub.f32 %v4705_v53, %v2158_v62  ;;  %2076 = vmatpush.msrb.mxu2 %v4718_v35  ;;  %2149 = vmatpush.msrb.mxu3 %v2148_v29  ;;  %v4740_v51 = vsub.f32 %v1669_v33, %v4718_v35 }
 0x1da   :  { %v2165_v56 = vsub.f32 %v4721_v31, %v5392_v2  ;;  %v4760_v2 = vsub.f32 %v1667_v36, %v4746_v21 }
 0x1db   :  { %v4725_v19 = vadd.f32 1e-05, %v1613_v18  ;;  %v5450_v18 = vand.u32 4294901760, %v4527_v43  ;;  %v2160_v27 = vand.u32 4294901760, %v2159_v54  ;;  %2078 = vmatpush.msrb.mxu2 %v4733_v3  ;;  %v4749_v43 = vsub.f32 %v1668_v23, %v4733_v3  ;;  %2155 = vmatpush.msrb.mxu3 %v2154_v58  ;;  %v1666_v54 = vld [vmem:[#allocation8 + $0x88] sm:$0xff] }
 0x1dc   :  { %v5394_v50 = vand.u32 4294901760, %v4740_v51  ;;  %v2166_v33 = vand.u32 4294901760, %v2165_v56  ;;  %v5452_v23 = vand.u32 4294901760, %v4544_v16  ;;  %v2182_v36 = vand.u32 4294901760, %v4760_v2 }
 0x1dd   :  { %1986 = vmatpush.msrb.mxu0 %v5450_v18  ;;  %3206 = vrsqrt.f32 %v4725_v19  ;;  %2080 = vmatpush.msrb.mxu2 %v4746_v21  ;;  %v5393_v29 = vand.u32 4294901760, %v4749_v43  ;;  %v4757_v18 = vand.u32 4294901760, %v1666_v54  ;;  %v4773_v56 = vand.u32 4294901760, %v1665_v7 }
 0x1de   :  { %2161 = vmatpush.msrb.mxu3 %v2160_v27  ;;  %v2171_v38 = vsub.f32 %v4740_v51, %v5394_v50  ;;  %v2183_v50 = vsub.f32 %v4760_v2, %v2182_v36  ;;  %vm1622_vm1 = vweird.f32 %v4725_v19 }
 0x1df   :  { %1990 = vmatpush.msrb.mxu0 %v5451_v28  ;;  %v2177_v58 = vsub.f32 %v4749_v43, %v5393_v29  ;;  %2082 = vmatpush.msrb.mxu2 %v4757_v18  ;;  %v4776_v16 = vsub.f32 %v1666_v54, %v4757_v18  ;;  %v5454_v54 = vand.u32 4294901760, %v4571_v1  ;;  %v4791_v20 = vsub.f32 %v1665_v7, %v4773_v56 }
 0x1e0   :  { %2167 = vmatpush.msrb.mxu3 %v2166_v33  ;;  %v2172_v28 = vand.u32 4294901760, %v2171_v38  ;;  %v2184_v38 = vand.u32 4294901760, %v2183_v50  ;;  %v1614_v50 = vld [vmem:[%s5351_s5] sm:$0x1] }
 0x1e1   :  { %1994 = vmatpush.msrb.mxu0 %v5452_v23  ;;  %v2178_v29 = vand.u32 4294901760, %v2177_v58  ;;  %2084 = vmatpush.msrb.mxu2 %v4773_v56  ;;  %v5396_v37 = vand.u32 4294901760, %v4776_v16  ;;  %v5395_v1 = vand.u32 4294901760, %v4791_v20 }
 0x1e2   :  { %2173 = vmatpush.msrb.mxu3 %v2172_v28 }
 0x1e3   :  { %1998 = vmatpush.msrb.mxu0 %v5453_v9  ;;  %v3207_v27 = vpop.eup %3206  ;;  %v2189_v58 = vsub.f32 %v4776_v16, %v5396_v37  ;;  %v2195_v7 = vsub.f32 %v4791_v20, %v5395_v1 }
 0x1e4   :  { %v1617_v23 = vmul.f32 %v3207_v27, %v4725_v19  ;;  %2179 = vmatpush.msrb.mxu3 %v2178_v29  ;;  %vm1623_vm0 = vweird.f32 %v3207_v27 }
 0x1e5   :  { %2002 = vmatpush.msrb.mxu0 %v5454_v54  ;;  %v2190_v17 = vand.u32 4294901760, %v2189_v58  ;;  %v2196_v41 = vand.u32 4294901760, %v2195_v7  ;;  %vm1624_vm2 = vmor %vm1622_vm1, %vm1623_vm0  ;;  %v1627_v54 = vld [vmem:[%s5352_s6] sm:$0x1] }
 0x1e6   :  { %v1618_v33 = vmul.f32 %v3207_v27, %v1617_v23  ;;  %2185 = vmatpush.msrb.mxu3 %v2184_v38 }
 0x1e8   :  { %v1619_v9 = vmul.f32 0.5, %v1618_v33  ;;  %2191 = vmatpush.msrb.mxu3 %v2190_v17 }
 0x1ea   :  { %v1620_v28 = vsub.f32 1.5, %v1619_v9  ;;  %2197 = vmatpush.msrb.mxu3 %v2196_v41 }
 0x1ec   :  { %v1621_v29 = vmul.f32 %v3207_v27, %v1620_v28 }
 0x1ee   :  { %v1625_v52 = vsel %vm1624_vm2, %v3207_v27, %v1621_v29 }
 0x1ef   :  { %v1626_v23 = vmul.f32 %v1625_v52, %v1614_v50 }
 0x1f1   :  { %v1628_v33 = vmul.f32 %v1626_v23, %v4653_v42  ;;  %v1631_v38 = vperm.slane %v1626_v23, 0 }
 0x1f3   :  { %v1629_v58 = vsub.f32 %v1627_v54, %v1628_v33  ;;  %v1633_v9 = vmul.f32 %v1631_v38, %v4308_v4  ;;  %v1634_v17 = vmul.f32 %v1631_v38, %v4311_v5  ;;  %v2441_v33 = vld [vmem:[#allocation9 + $0x48] sm:$0xff] }
 0x1f5   :  { %v1636_v7 = vperm.slane %v1629_v58, 0 }
 0x1f7   :  { %v1638_v28 = vadd.f32 %v1636_v7, %v1633_v9  ;;  %v1639_v1 = vadd.f32 %v1636_v7, %v1634_v17  ;;  %v4999_v17 = vand.u32 4294901760, %v2441_v33 }
 0x1f9   :  { %v1640_v19 = vmax.f32 %v1638_v28, 0.0  ;;  %v1641_v37 = vmax.f32 %v1639_v1, 0.0  ;;  %v2440_v28 = vld [vmem:[#allocation9 + $0x40] sm:$0xff] }
 0x1fb   :  { %v1642_v27 = vmul.f32 %v1640_v19, %v4303_v61  ;;  %v1643_v41 = vmul.f32 %v1641_v37, %v4305_v63 }
 0x1fd   :  { %1645 = vst [vmem:[#allocation2 + $0x1] sm:$0xff] %v1642_v27  ;;  %v4824_v61 = vand.u32 4294901760, %v1642_v27 }
 0x1fe   :  { %1646 = vst [vmem:[#allocation2 + $0x9] sm:$0xff] %v1643_v41 }
 0x204   :  { %v1647_v50 = vld [vmem:[#allocation2] sm:$0xff] }
 0x205   :  { %v4814_v29 = vand.u32 4294901760, %v1647_v50  ;;  %v1648_v42 = vld [vmem:[#allocation2 + $0x8] sm:$0xff] }
 0x206   :  { %v4818_v5 = vand.u32 4294901760, %v1648_v42 }
 0x207   :  { %1827 = vmatmul.f32.vlgmr.msra.gmra.mxu1 %v4814_v29  ;;  %v1714_v4 = vsub.f32 %v1647_v50, %v4814_v29  ;;  %v5015_v50 = vand.u32 4294901760, %v2440_v28 }
 0x208   :  { %2267 = vmatpush.msra.mxu1 %v4583_v12  ;;  %v1722_v37 = vsub.f32 %v1648_v42, %v4818_v5  ;;  %v2439_v42 = vld [vmem:[#allocation9 + $0x38] sm:$0xff] }
 0x209   :  { %1885 = vmatmul.f32.vlgmr.msra.gmra.mxu2 %v1714_v4  ;;  %v1715_v1 = vand.u32 4294901760, %v1714_v4 }
 0x20a   :  { %2269 = vmatpush.msra.mxu1 %v4594_v22  ;;  %2314 = vmatpush.msra.mxu2 %v2104_v40  ;;  %v4835_v40 = vsub.f32 %v1642_v27, %v4824_v61  ;;  %v1723_v23 = vand.u32 4294901760, %v1722_v37 }
 0x20b   :  { %1929 = vmatmul.f32.vlgmr.msra.gmra.mxu3 %v1715_v1  ;;  %v1716_v63 = vsub.f32 %v1714_v4, %v1715_v1  ;;  %v5029_v1 = vsub.f32 %v2440_v28, %v5015_v50 }
 0x20c   :  { %2271 = vmatpush.msra.mxu1 %v4600_v47  ;;  %2318 = vmatpush.msra.mxu2 %v2110_v39 }
 0x20d   :  { %2385 = vmatpush.msra.mxu3 %v4583_v12  ;;  %v1717_v52 = vand.u32 4294901760, %v1716_v63  ;;  %v2087_v12 = vand.u32 4294901760, %v4835_v40 }
 0x20e   :  { %2273 = vmatpush.msra.mxu1 %v4612_v57  ;;  %2322 = vmatpush.msra.mxu2 %v2116_v6  ;;  %v5455_v6 = vand.u32 4294901760, %v4694_v13 }
 0x20f   :  { %2387 = vmatpush.msra.mxu3 %v4594_v22  ;;  %1718 = vmatmul.f32.vlgmr.msra.gmra.mxu0 %v1717_v52  ;;  %v1724_v22 = vsub.f32 %v1722_v37, %v1723_v23 }
 0x210   :  { %1831 = vmatmul.f32.gmra.mxu1 %v4818_v5  ;;  %2209 = vmatpush.msra.mxu0 %v4592_v24  ;;  %v4850_v24 = vand.u32 4294901760, %v1643_v41 }
 0x211   :  { %2275 = vmatpush.msra.mxu1 %v4625_v26  ;;  %2326 = vmatpush.msra.mxu2 %v2122_v46  ;;  %v5458_v46 = vand.u32 4294901760, %v4749_v43 }
 0x212   :  { %2389 = vmatpush.msra.mxu3 %v4600_v47  ;;  %1890 = vmatmul.f32.gmra.mxu2 %v1722_v37  ;;  %v2088_v47 = vsub.f32 %v4835_v40, %v2087_v12  ;;  %v2094_v39 = vsub.f32 %v1643_v41, %v4850_v24  ;;  %v5013_v41 = vsub.f32 %v2441_v33, %v4999_v17  ;;  %v2438_v37 = vld [vmem:[#allocation9 + $0x30] sm:$0xff] }
 0x213   :  { %2212 = vmatpush.msra.mxu0 %v4603_v8  ;;  %2277 = vmatpush.msra.mxu1 %v4637_v14  ;;  %v1725_v8 = vand.u32 4294901760, %v1724_v22  ;;  %v5051_v22 = vand.u32 4294901760, %v2438_v37 }
 0x214   :  { %2330 = vmatpush.msra.mxu2 %v2128_v60  ;;  %2391 = vmatpush.msra.mxu3 %v4612_v57  ;;  %v2089_v57 = vand.u32 4294901760, %v2088_v47  ;;  %v5459_v60 = vand.u32 4294901760, %v4776_v16 }
 0x215   :  { %1935 = vmatmul.f32.gmra.mxu3 %v1723_v23  ;;  %2215 = vmatpush.msra.mxu0 %v4615_v32  ;;  %v2095_v32 = vand.u32 4294901760, %v2094_v39  ;;  %v5043_v23 = vand.u32 4294901760, %v5029_v1 }
 0x216   :  { %2279 = vmatpush.msra.mxu1 %v4648_v34  ;;  %2334 = vmatpush.msra.mxu2 %v2134_v10 }
 0x217   :  { %2393 = vmatpush.msra.mxu3 %v4625_v26  ;;  %2218 = vmatpush.msra.mxu0 %v4629_v44  ;;  %v2096_v26 = vsub.f32 %v2094_v39, %v2095_v32  ;;  %v5456_v44 = vand.u32 4294901760, %v4721_v31 }
 0x218   :  { %2281 = vmatpush.msra.mxu1 %v4666_v15  ;;  %2338 = vmatpush.msra.mxu2 %v2140_v25 }
 0x219   :  { %2395 = vmatpush.msra.mxu3 %v4637_v14  ;;  %1726 = vmatmul.f32.gmra.mxu0 %v1725_v8  ;;  %v2097_v14 = vand.u32 4294901760, %v2096_v26  ;;  %v2534_v8 = vsub.f32 %v5029_v1, %v5043_v23 }
 0x21a   :  { %2045 = vmatmul.f32.vlgmr.msrb.gmra.mxu1 %v4814_v29  ;;  %2221 = vmatpush.msra.mxu0 %v4640_v30  ;;  %v5457_v30 = vand.u32 4294901760, %v4740_v51 }
 0x21b   :  { %2283 = vmatpush.msra.mxu1 %v4679_v11  ;;  %2342 = vmatpush.msra.mxu2 %v2146_v49  ;;  %v2444_v49 = vld [vmem:[#allocation9 + $0x60] sm:$0xff]  ;;  %v5069_v26 = vand.u32 4294901760, %v2534_v8 }
 0x21c   :  { %2397 = vmatpush.msra.mxu3 %v4648_v34  ;;  %2090 = vmatmul.f32.vlgmr.msrb.gmra.mxu2 %v2089_v57  ;;  %v5460_v34 = vand.u32 4294901760, %v4791_v20 }
 0x21d   :  { %2224 = vmatpush.msra.mxu0 %v4651_v48  ;;  %2285 = vmatpush.msra.mxu1 %v4691_v0  ;;  %v2447_v48 = vld [vmem:[#allocation9 + $0x78] sm:$0xff] }
 0x21e   :  { %2346 = vmatpush.msra.mxu2 %v5455_v6  ;;  %2399 = vmatpush.msra.mxu3 %v4666_v15  ;;  %v4927_v10 = vand.u32 4294901760, %v2447_v48  ;;  %v2446_v15 = vld [vmem:[#allocation9 + $0x70] sm:$0xff]  ;;  %v2436_v6 = vld [vmem:[#allocation9 + $0x20] sm:$0xff] }
 0x21f   :  { %2199 = vmatmul.f32.vlgmr.msrb.gmra.mxu3 %v4824_v61  ;;  %2227 = vmatpush.msra.mxu0 %v4669_v45  ;;  %v4932_v25 = vand.u32 4294901760, %v2446_v15 }
 0x220   :  { %2287 = vmatpush.msra.mxu1 %v4702_v59  ;;  %2350 = vmatpush.msra.mxu2 %v2158_v62  ;;  %v4930_v45 = vsub.f32 %v2447_v48, %v4927_v10 }
 0x221   :  { %2401 = vmatpush.msra.mxu3 %v4679_v11  ;;  %2230 = vmatpush.msra.mxu0 %v4685_v55  ;;  %v2445_v11 = vld [vmem:[#allocation9 + $0x68] sm:$0xff] }
 0x222   :  { %2289 = vmatpush.msra.mxu1 %v4718_v35  ;;  %2354 = vmatpush.msra.mxu2 %v5456_v44  ;;  %v4937_v55 = vand.u32 4294901760, %v4930_v45 }
 0x223   :  { %2403 = vmatpush.msra.mxu3 %v4691_v0  ;;  %2004 = vmatmul.f32.vlgmr.msrb.gmra.mxu0 %v4814_v29  ;;  %v4940_v0 = vsub.f32 %v2446_v15, %v4932_v25 }
 0x224   :  { %2049 = vmatmul.f32.gmra.mxu1 %v4818_v5  ;;  %2233 = vmatpush.msra.mxu0 %v4694_v13  ;;  %v4943_v13 = vand.u32 4294901760, %v2445_v11 }
 0x225   :  { %2291 = vmatpush.msra.mxu1 %v4733_v3  ;;  %2358 = vmatpush.msra.mxu2 %v5457_v30  ;;  %v5076_v30 = vand.u32 4294901760, %v2436_v6 }
 0x226   :  { %2405 = vmatpush.msra.mxu3 %v4702_v59  ;;  %2098 = vmatmul.f32.gmra.mxu2 %v2097_v14  ;;  %v2492_v59 = vsub.f32 %v4930_v45, %v4937_v55  ;;  %v4953_v62 = vsub.f32 %v2445_v11, %v4943_v13 }
 0x227   :  { %2236 = vmatpush.msra.mxu0 %v4705_v53  ;;  %2293 = vmatpush.msra.mxu1 %v4746_v21  ;;  %v4950_v53 = vand.u32 4294901760, %v4940_v0  ;;  %v5091_v15 = vsub.f32 %v2436_v6, %v5076_v30 }
 0x228   :  { %2362 = vmatpush.msra.mxu2 %v5458_v46  ;;  %2407 = vmatpush.msra.mxu3 %v4718_v35  ;;  %v4956_v35 = vand.u32 4294901760, %v2444_v49 }
 0x229   :  { %2203 = vmatmul.f32.gmra.mxu3 %v4850_v24  ;;  %2239 = vmatpush.msra.mxu0 %v4721_v31  ;;  %v2443_v31 = vld [vmem:[#allocation9 + $0x58] sm:$0xff]  ;;  %5464 = vst [vmem:[#allocation20_spill] sm:$0xff] %v5091_v15 }
 0x22a   :  { %2295 = vmatpush.msra.mxu1 %v4757_v18  ;;  %2366 = vmatpush.msra.mxu2 %v2182_v36 }
 0x22b   :  { %2409 = vmatpush.msra.mxu3 %v4733_v3  ;;  %2242 = vmatpush.msra.mxu0 %v4740_v51  ;;  %v2498_v3 = vsub.f32 %v4940_v0, %v4950_v53  ;;  %v4965_v51 = vand.u32 4294901760, %v4953_v62 }
 0x22c   :  { %2297 = vmatpush.msra.mxu1 %v4773_v56  ;;  %2370 = vmatpush.msra.mxu2 %v5459_v60  ;;  %v2435_v60 = vld [vmem:[#allocation9 + $0x18] sm:$0xff] }
 0x22d   :  { %2411 = vmatpush.msra.mxu3 %v4746_v21  ;;  %2008 = vmatmul.f32.gmra.mxu0 %v4818_v5  ;;  %v4968_v21 = vsub.f32 %v2444_v49, %v4956_v35  ;;  %v4976_v36 = vand.u32 4294901760, %v2498_v3  ;;  %v5026_v5 = vand.u32 4294901760, %v5013_v41  ;;  %v5093_v11 = vand.u32 4294901760, %v2435_v60 }
 0x22e   :  { %2301 = vmatmul.f32.vlgmr.msra.gmra.mxu1 %v2087_v12  ;;  %2245 = vmatpush.msra.mxu0 %v4749_v43  ;;  %v4972_v43 = vand.u32 4294901760, %v2443_v31  ;;  %v5104_v3 = vand.u32 4294901760, %v5091_v15 }
 0x22f   :  { %2374 = vmatpush.msra.mxu2 %v5460_v34  ;;  %2413 = vmatpush.msra.mxu3 %v4757_v18  ;;  %v2442_v18 = vld [vmem:[#allocation9 + $0x50] sm:$0xff] }
 0x230   :  { %2376 = vmatmul.f32.vlgmr.msra.gmra.mxu2 %v4824_v61  ;;  %2248 = vmatpush.msra.mxu0 %v4760_v2  ;;  %v4960_v2 = vand.u32 4294901760, %v2492_v59  ;;  %v4987_v54 = vsub.f32 %v2443_v31, %v4972_v43  ;;  %v2434_v59 = vld [vmem:[#allocation9 + $0x10] sm:$0xff] }
 0x231   :  { %2415 = vmatpush.msra.mxu3 %v4773_v56  ;;  %2592 = vmatpush.msrb.mxu2 %v4930_v45  ;;  %v2504_v56 = vsub.f32 %v4953_v62, %v4965_v51 }
 0x232   :  { %2417 = vmatmul.f32.vlgmr.msra.gmra.mxu3 %v4824_v61  ;;  %2251 = vmatpush.msra.mxu0 %v4776_v16  ;;  %v4981_v16 = vand.u32 4294901760, %v4968_v21  ;;  %v5002_v7 = vand.u32 4294901760, %v4987_v54  ;;  %v5031_v61 = vand.u32 4294901760, %v2439_v42 }
 0x233   :  { %2645 = vmatpush.msrb.mxu3 %v4927_v10  ;;  %2595 = vmatpush.msrb.mxu2 %v4940_v0  ;;  %v4992_v38 = vand.u32 4294901760, %v2504_v56  ;;  %v5109_v56 = vand.u32 4294901760, %v2434_v59 }
 0x234   :  { %2254 = vmatpush.msra.mxu0 %v4791_v20  ;;  %2494 = vmatpush.msrb.mxu1 %v4960_v2  ;;  %v4984_v20 = vand.u32 4294901760, %v2442_v18  ;;  %v2510_v58 = vsub.f32 %v4968_v21, %v4981_v16  ;;  %v2516_v29 = vsub.f32 %v4987_v54, %v5002_v7  ;;  %v5046_v12 = vsub.f32 %v2439_v42, %v5031_v61 }
 0x235   :  { %2257 = vmatmul.f32.vlgmr.msra.gmra.mxu0 %v4835_v40  ;;  %2647 = vmatpush.msrb.mxu3 %v4932_v25  ;;  %v2528_v40 = vsub.f32 %v5013_v41, %v5026_v5 }
 0x236   :  { %2307 = vmatmul.f32.gmra.mxu1 %v2095_v32  ;;  %2449 = vmatpush.msrb.mxu0 %v4927_v10  ;;  %v4997_v9 = vsub.f32 %v2442_v18, %v4984_v20  ;;  %v5007_v19 = vand.u32 4294901760, %v2510_v58  ;;  %v5034_v63 = vand.u32 4294901760, %v2516_v29  ;;  %5461 = vst [vmem:[#allocation17_spill] sm:$0xff] %v5046_v12  ;;  %v5066_v32 = vsub.f32 %v2438_v37, %v5051_v22  ;;  %v2433_v58 = vld [vmem:[#allocation9 + $0x8] sm:$0xff] }
 0x237   :  { %2649 = vmatpush.msrb.mxu3 %v4943_v13  ;;  %2598 = vmatpush.msrb.mxu2 %v4953_v62  ;;  %v5053_v47 = vand.u32 4294901760, %v2528_v40  ;;  %v5107_v18 = vsub.f32 %v2435_v60, %v5093_v11  ;;  %v2558_v29 = vsub.f32 %v5091_v15, %v5104_v3  ;;  %v5131_v37 = vand.u32 4294901760, %v2433_v58  ;;  %v2432_v40 = vld [vmem:[#allocation9] sm:$0xff] }
 0x238   :  { %2380 = vmatmul.f32.gmra.mxu2 %v4850_v24  ;;  %2451 = vmatpush.msrb.mxu0 %v4932_v25  ;;  %v5010_v27 = vand.u32 4294901760, %v4997_v9  ;;  %5462 = vst [vmem:[#allocation18_spill] sm:$0xff] %v5066_v32  ;;  %v5082_v46 = vand.u32 4294901760, %v5066_v32  ;;  %v5140_v60 = vand.u32 4294901760, %v2432_v40 }
 0x239   :  { %2651 = vmatpush.msrb.mxu3 %v4956_v35  ;;  %2601 = vmatpush.msrb.mxu2 %v4968_v21  ;;  %5465 = vst [vmem:[#allocation21_spill] sm:$0xff] %v5107_v18  ;;  %v5122_v42 = vand.u32 4294901760, %v5107_v18  ;;  %v5133_v8 = vand.u32 4294901760, %v2558_v29 }
 0x23a   :  { %2421 = vmatmul.f32.gmra.mxu3 %v4850_v24  ;;  %2453 = vmatpush.msrb.mxu0 %v4943_v13  ;;  %v2522_v4 = vsub.f32 %v4997_v9, %v5010_v27  ;;  %v2437_v24 = vld [vmem:[#allocation9 + $0x28] sm:$0xff]  ;;  %v2546_v49 = vsub.f32 %v5066_v32, %v5082_v46 }
 0x23b   :  { %2653 = vmatpush.msrb.mxu3 %v4972_v43  ;;  %2500 = vmatpush.msrb.mxu1 %v4976_v36  ;;  %v5060_v57 = vand.u32 4294901760, %v2437_v24  ;;  %v2564_v6 = vsub.f32 %v5107_v18, %v5122_v42 }
 0x23c   :  { %2455 = vmatpush.msrb.mxu0 %v4956_v35  ;;  %2604 = vmatpush.msrb.mxu2 %v4987_v54  ;;  %v5038_v52 = vand.u32 4294901760, %v2522_v4  ;;  %v5114_v33 = vand.u32 4294901760, %v2546_v49  ;;  %v5125_v4 = vsub.f32 %v2434_v59, %v5109_v56  ;;  %v5146_v49 = vsub.f32 %v2433_v58, %v5131_v37 }
 0x23d   :  { %2262 = vmatmul.f32.gmra.mxu0 %v2094_v39  ;;  %2655 = vmatpush.msrb.mxu3 %v4984_v20  ;;  %v5058_v39 = vand.u32 4294901760, %v5046_v12  ;;  %v5074_v14 = vsub.f32 %v2437_v24, %v5060_v57  ;;  %v5149_v29 = vand.u32 4294901760, %v2564_v6 }
 0x23e   :  { %2457 = vmatpush.msrb.mxu0 %v4972_v43  ;;  %2506 = vmatpush.msrb.mxu1 %v4992_v38  ;;  %5466 = vst [vmem:[#allocation22_spill] sm:$0xff] %v5125_v4  ;;  %v5160_v58 = vand.u32 4294901760, %v5146_v49 }
 0x23f   :  { %2607 = vmatpush.msrb.mxu2 %v4997_v9  ;;  %2657 = vmatpush.msrb.mxu3 %v4999_v17  ;;  %v2540_v44 = vsub.f32 %v5046_v12, %v5058_v39  ;;  %5463 = vst [vmem:[#allocation19_spill] sm:$0xff] %v5074_v14  ;;  %v5088_v48 = vand.u32 4294901760, %v5074_v14 }
 0x240   :  { %2459 = vmatpush.msrb.mxu0 %v4984_v20  ;;  %2512 = vmatpush.msrb.mxu1 %v5007_v19 }
 0x241   :  { %2610 = vmatpush.msrb.mxu2 %v5013_v41  ;;  %2659 = vmatpush.msrb.mxu3 %v5015_v50  ;;  %v5085_v34 = vand.u32 4294901760, %v2540_v44  ;;  %v2552_v31 = vsub.f32 %v5074_v14, %v5088_v48  ;;  %v5138_v44 = vand.u32 4294901760, %v5125_v4 }
 0x242   :  { %2461 = vmatpush.msrb.mxu0 %v4999_v17  ;;  %2518 = vmatpush.msrb.mxu1 %v5034_v63 }
 0x243   :  { %2613 = vmatpush.msrb.mxu2 %v5029_v1  ;;  %2661 = vmatpush.msrb.mxu3 %v5031_v61  ;;  %v5117_v28 = vand.u32 4294901760, %v2552_v31 }
 0x244   :  { %2463 = vmatpush.msrb.mxu0 %v5015_v50  ;;  %2524 = vmatpush.msrb.mxu1 %v5038_v52 }
 0x245   :  { %2616 = vmatpush.msrb.mxu2 %v5046_v12  ;;  %2663 = vmatpush.msrb.mxu3 %v5051_v22 }
 0x246   :  { %2465 = vmatpush.msrb.mxu0 %v5031_v61  ;;  %2530 = vmatpush.msrb.mxu1 %v5053_v47 }
 0x247   :  { %2619 = vmatpush.msrb.mxu2 %v5066_v32  ;;  %2665 = vmatpush.msrb.mxu3 %v5060_v57 }
 0x248   :  { %2467 = vmatpush.msrb.mxu0 %v5051_v22  ;;  %2536 = vmatpush.msrb.mxu1 %v5069_v26 }
 0x249   :  { %2622 = vmatpush.msrb.mxu2 %v5074_v14  ;;  %2667 = vmatpush.msrb.mxu3 %v5076_v30 }
 0x24a   :  { %2469 = vmatpush.msrb.mxu0 %v5060_v57  ;;  %2542 = vmatpush.msrb.mxu1 %v5085_v34 }
 0x24b   :  { %2625 = vmatpush.msrb.mxu2 %v5091_v15  ;;  %2669 = vmatpush.msrb.mxu3 %v5093_v11  ;;  %v5154_v15 = vsub.f32 %v2432_v40, %v5140_v60  ;;  %v2576_v40 = vsub.f32 %v5146_v49, %v5160_v58 }
 0x24c   :  { %2471 = vmatpush.msrb.mxu0 %v5076_v30  ;;  %2548 = vmatpush.msrb.mxu1 %v5114_v33 }
 0x24d   :  { %2628 = vmatpush.msrb.mxu2 %v5107_v18  ;;  %2671 = vmatpush.msrb.mxu3 %v5109_v56  ;;  %v2570_v18 = vsub.f32 %v5125_v4, %v5138_v44  ;;  %5467 = vst [vmem:[#allocation23_spill] sm:$0xff] %v5154_v15  ;;  %v5166_v32 = vand.u32 4294901760, %v5154_v15 }
 0x24e   :  { %2473 = vmatpush.msrb.mxu0 %v5093_v11  ;;  %2554 = vmatpush.msrb.mxu1 %v5117_v28 }
 0x24f   :  { %2631 = vmatpush.msrb.mxu2 %v5125_v4  ;;  %2673 = vmatpush.msrb.mxu3 %v5131_v37  ;;  %v5163_v6 = vand.u32 4294901760, %v2570_v18  ;;  %v2582_v4 = vsub.f32 %v5154_v15, %v5166_v32  ;;  %v5179_v18 = vand.u32 4294901760, %v2576_v40 }
 0x250   :  { %2475 = vmatpush.msrb.mxu0 %v5109_v56  ;;  %2560 = vmatpush.msrb.mxu1 %v5133_v8 }
 0x251   :  { %2634 = vmatpush.msrb.mxu2 %v5146_v49  ;;  %2675 = vmatpush.msrb.mxu3 %v5140_v60  ;;  %v5182_v12 = vand.u32 4294901760, %v2582_v4 }
 0x252   :  { %2477 = vmatpush.msrb.mxu0 %v5131_v37  ;;  %2566 = vmatpush.msrb.mxu1 %v5149_v29 }
 0x253   :  { %2637 = vmatpush.msrb.mxu2 %v5154_v15  ;;  %2844 = vmatpush.msra.mxu3 %v4960_v2 }
 0x254   :  { %2479 = vmatpush.msrb.mxu0 %v5140_v60  ;;  %2572 = vmatpush.msrb.mxu1 %v5163_v6 }
 0x255   :  { %2799 = vmatpush.msra.mxu2 %v4927_v10  ;;  %2850 = vmatpush.msra.mxu3 %v4976_v36 }
 0x256   :  { %2686 = vmatpush.msra.mxu0 %v4937_v55  ;;  %2578 = vmatpush.msrb.mxu1 %v5179_v18 }
 0x257   :  { %2801 = vmatpush.msra.mxu2 %v4932_v25  ;;  %2856 = vmatpush.msra.mxu3 %v4992_v38 }
 0x258   :  { %2690 = vmatpush.msra.mxu0 %v4950_v53  ;;  %2584 = vmatpush.msrb.mxu1 %v5182_v12 }
 0x259   :  { %2803 = vmatpush.msra.mxu2 %v4943_v13  ;;  %2862 = vmatpush.msra.mxu3 %v5007_v19 }
 0x25a   :  { %2694 = vmatpush.msra.mxu0 %v4965_v51  ;;  %2753 = vmatpush.msra.mxu1 %v4927_v10 }
 0x25b   :  { %2805 = vmatpush.msra.mxu2 %v4956_v35  ;;  %2868 = vmatpush.msra.mxu3 %v5034_v63 }
 0x25c   :  { %2698 = vmatpush.msra.mxu0 %v4981_v16  ;;  %2755 = vmatpush.msra.mxu1 %v4932_v25 }
 0x25d   :  { %2807 = vmatpush.msra.mxu2 %v4972_v43  ;;  %2874 = vmatpush.msra.mxu3 %v5038_v52 }
 0x25e   :  { %2702 = vmatpush.msra.mxu0 %v5002_v7  ;;  %2757 = vmatpush.msra.mxu1 %v4943_v13 }
 0x25f   :  { %2809 = vmatpush.msra.mxu2 %v4984_v20  ;;  %2880 = vmatpush.msra.mxu3 %v5053_v47 }
 0x260   :  { %2706 = vmatpush.msra.mxu0 %v5010_v27  ;;  %2759 = vmatpush.msra.mxu1 %v4956_v35 }
 0x261   :  { %2811 = vmatpush.msra.mxu2 %v4999_v17  ;;  %2886 = vmatpush.msra.mxu3 %v5069_v26 }
 0x262   :  { %2710 = vmatpush.msra.mxu0 %v5026_v5  ;;  %2761 = vmatpush.msra.mxu1 %v4972_v43 }
 0x263   :  { %2813 = vmatpush.msra.mxu2 %v5015_v50  ;;  %2892 = vmatpush.msra.mxu3 %v5085_v34 }
 0x264   :  { %2714 = vmatpush.msra.mxu0 %v5043_v23  ;;  %2763 = vmatpush.msra.mxu1 %v4984_v20 }
 0x265   :  { %2815 = vmatpush.msra.mxu2 %v5031_v61  ;;  %2898 = vmatpush.msra.mxu3 %v5114_v33 }
 0x266   :  { %2718 = vmatpush.msra.mxu0 %v5058_v39  ;;  %2765 = vmatpush.msra.mxu1 %v4999_v17 }
 0x267   :  { %2817 = vmatpush.msra.mxu2 %v5051_v22  ;;  %2904 = vmatpush.msra.mxu3 %v5117_v28 }
 0x268   :  { %2722 = vmatpush.msra.mxu0 %v5082_v46  ;;  %2767 = vmatpush.msra.mxu1 %v5015_v50 }
 0x269   :  { %2819 = vmatpush.msra.mxu2 %v5060_v57  ;;  %2910 = vmatpush.msra.mxu3 %v5133_v8 }
 0x26a   :  { %2726 = vmatpush.msra.mxu0 %v5088_v48  ;;  %2769 = vmatpush.msra.mxu1 %v5031_v61 }
 0x26b   :  { %2821 = vmatpush.msra.mxu2 %v5076_v30  ;;  %2916 = vmatpush.msra.mxu3 %v5149_v29 }
 0x26c   :  { %2730 = vmatpush.msra.mxu0 %v5104_v3  ;;  %2771 = vmatpush.msra.mxu1 %v5051_v22 }
 0x26d   :  { %2823 = vmatpush.msra.mxu2 %v5093_v11  ;;  %2922 = vmatpush.msra.mxu3 %v5163_v6 }
 0x26e   :  { %2734 = vmatpush.msra.mxu0 %v5122_v42  ;;  %2773 = vmatpush.msra.mxu1 %v5060_v57 }
 0x26f   :  { %2825 = vmatpush.msra.mxu2 %v5109_v56  ;;  %2928 = vmatpush.msra.mxu3 %v5179_v18 }
 0x270   :  { %2738 = vmatpush.msra.mxu0 %v5138_v44  ;;  %2775 = vmatpush.msra.mxu1 %v5076_v30 }
 0x271   :  { %2827 = vmatpush.msra.mxu2 %v5131_v37  ;;  %2934 = vmatpush.msra.mxu3 %v5182_v12 }
 0x272   :  { %2742 = vmatpush.msra.mxu0 %v5160_v58  ;;  %2777 = vmatpush.msra.mxu1 %v5093_v11 }
 0x273   :  { %2829 = vmatpush.msra.mxu2 %v5140_v60 }
 0x274   :  { %2746 = vmatpush.msra.mxu0 %v5166_v32  ;;  %2779 = vmatpush.msra.mxu1 %v5109_v56 }
 0x276   :  { %2781 = vmatpush.msra.mxu1 %v5131_v37 }
 0x278   :  { %2783 = vmatpush.msra.mxu1 %v5140_v60 }
 0x284   :  { %v1828_v24 = vpop.f32.mrf.mxu1 }
 0x28c   :  { %v1719_v59 = vpop.f32.mrf.mxu0  ;;  %v1886_v31 = vpop.f32.mrf.mxu2 }
 0x28d   :  { %v1832_v15 = vpop.f32.mrf.mxu1  ;;  %v1829_v38 = vadd.f32 %v1828_v24, %v1719_v59 }
 0x28e   :  { %v1930_v14 = vpop.f32.mrf.mxu3 }
 0x28f   :  { %v1887_v63 = vadd.f32 %v1886_v31, %v1829_v38 }
 0x291   :  { %v1931_v59 = vadd.f32 %v1930_v14, %v1887_v63 }
 0x295   :  { %v1891_v4 = vpop.f32.mrf.mxu2 }
 0x296   :  { %v1727_v2 = vpop.f32.mrf.mxu0 }
 0x297   :  { %v2046_v19 = vpop.f32.mrf.mxu1  ;;  %v1833_v31 = vadd.f32 %v1832_v15, %v1727_v2 }
 0x298   :  { %v1936_v36 = vpop.f32.mrf.mxu3 }
 0x299   :  { %v1892_v34 = vadd.f32 %v1891_v4, %v1833_v31 }
 0x29b   :  { %v1937_v40 = vadd.f32 %v1936_v36, %v1892_v34 }
 0x29f   :  { %v2091_v24 = vpop.f32.mrf.mxu2 }
 0x2a0   :  { %v2005_v52 = vpop.f32.mrf.mxu0 }
 0x2a1   :  { %v2006_v26 = vadd.f32 %v2005_v52, %v1931_v59  ;;  %v2050_v14 = vpop.f32.mrf.mxu1 }
 0x2a2   :  { %v2200_v47 = vpop.f32.mrf.mxu3 }
 0x2a3   :  { %v2047_v15 = vadd.f32 %v2046_v19, %v2006_v26 }
 0x2a5   :  { %v2092_v2 = vadd.f32 %v2091_v24, %v2047_v15 }
 0x2a7   :  { %v2201_v6 = vadd.f32 %v2200_v47, %v2092_v2 }
 0x2a9   :  { %v2099_v28 = vpop.f32.mrf.mxu2 }
 0x2aa   :  { %v2009_v33 = vpop.f32.mrf.mxu0 }
 0x2ab   :  { %v2010_v29 = vadd.f32 %v2009_v33, %v1937_v40  ;;  %v2302_v36 = vpop.f32.mrf.mxu1 }
 0x2ac   :  { %v2204_v8 = vpop.f32.mrf.mxu3 }
 0x2ad   :  { %v2051_v4 = vadd.f32 %v2050_v14, %v2010_v29 }
 0x2af   :  { %v2100_v63 = vadd.f32 %v2099_v28, %v2051_v4 }
 0x2b1   :  { %v2205_v59 = vadd.f32 %v2204_v8, %v2100_v63 }
 0x2b2   :  { %v2258_v38 = vpop.f32.mrf.mxu0 }
 0x2b3   :  { %v2259_v19 = vadd.f32 %v2258_v38, %v2201_v6  ;;  %v2377_v18 = vpop.f32.mrf.mxu2  ;;  %v2308_v34 = vpop.f32.mrf.mxu1 }
 0x2b5   :  { %v2418_v52 = vpop.f32.mrf.mxu3  ;;  %v2303_v24 = vadd.f32 %v2302_v36, %v2259_v19 }
 0x2b7   :  { %v2378_v12 = vadd.f32 %v2377_v18, %v2303_v24 }
 0x2b9   :  { %v5247_v47 = vadd.f32 %v2418_v52, %v2378_v12 }
 0x2ba   :  { %v2263_v31 = vpop.f32.mrf.mxu0 }
 0x2bb   :  { %v2264_v26 = vadd.f32 %v2263_v31, %v2205_v59  ;;  %v2381_v33 = vpop.f32.mrf.mxu2  ;;  %v2789_v29 = vmul.f32 %v5247_v47, %v5247_v47 }
 0x2bd   :  { %v2309_v15 = vadd.f32 %v2308_v34, %v2264_v26  ;;  %v2422_v40 = vpop.f32.mrf.mxu3 }
 0x2bf   :  { %v2382_v14 = vadd.f32 %v2381_v33, %v2309_v15 }
 0x2c1   :  { %v5249_v2 = vadd.f32 %v2422_v40, %v2382_v14 }
 0x2c3   :  { %v2425_v28 = vadd.f32 %v5249_v2, %v5247_v47  ;;  %v2790_v8 = vmul.f32 %v5249_v2, %v5249_v2 }
 0x2c5   :  { %v2426_v6 = vrot.slane %v2425_v28, 4  ;;  %v2791_v4 = vadd.f32 %v2790_v8, %v2789_v29 }
 0x2c7   :  { %v2427_v36 = vadd.f32 %v2426_v6, %v2425_v28  ;;  %v2792_v38 = vrot.slane %v2791_v4, 4 }
 0x2c9   :  { %v2428_v19 = vrot.slane %v2427_v36, 2  ;;  %v2793_v18 = vadd.f32 %v2792_v38, %v2791_v4  ;;  %v3144_v4 = vld [vmem:[%s5353_s7] sm:$0x1]  ;;  %s3372_s7 = smov [#allocation12]  }
 0x2ca   :  { %s3180_s16 = sshll.u32 %s3372_s7, 4  ;;  %s3181_s16 = int_to_ptr.vmem [resolvable:$true] %s3180_s16 }
 0x2cb   :  { %v2429_v63 = vadd.f32 %v2428_v19, %v2427_v36  ;;  %v2794_v52 = vrot.slane %v2793_v18, 2 }
 0x2cd   :  { %v2430_v24 = vrot.slane %v2429_v63, 1  ;;  %v2795_v59 = vadd.f32 %v2794_v52, %v2793_v18  ;;  %v3157_v18 = vld [vmem:[%s5354_s8] sm:$0x1]  ;;  %s3182_s8 = sshll.u32 %s5355_s9, 4  ;;  %s3183_s8 = int_to_ptr.hbm [resolvable:$true] %s3182_s8 }
 0x2cf   :  { %v2796_v31 = vrot.slane %v2795_v59, 1  ;;  %v2431_v12 = vadd.f32 %v2430_v24, %v2429_v63 }
 0x2d1   :  { %v2797_v26 = vadd.f32 %v2796_v31, %v2795_v59  ;;  %v2480_v34 = vand.u32 4294901760, %v2431_v12 }
 0x2d3   :  { %v5257_v15 = vand.u32 4294901760, %v2797_v26  ;;  %2586 = vmatmul.f32.vlgmr.msrb.gmra.mxu1 %v2480_v34  ;;  %v2481_v33 = vsub.f32 %v2431_v12, %v2480_v34 }
 0x2d4   :  { %2995 = vmatpush.msrb.mxu1 %v4927_v10 }
 0x2d5   :  { %2640 = vmatmul.f32.vlgmr.msrb.gmra.mxu2 %v2481_v33  ;;  %v2482_v14 = vand.u32 4294901760, %v2481_v33  ;;  %v5261_v40 = vsub.f32 %v2797_v26, %v5257_v15 }
 0x2d6   :  { %2997 = vmatpush.msrb.mxu1 %v4932_v25  ;;  %3036 = vmatpush.msrb.mxu2 %v4937_v55 }
 0x2d7   :  { %2679 = vmatmul.f32.vlgmr.msrb.gmra.mxu3 %v2482_v14  ;;  %v2483_v29 = vsub.f32 %v2481_v33, %v2482_v14  ;;  %v2832_v28 = vand.u32 4294901760, %v5261_v40  ;;  %v3211_v14 = vld [vmem:[#allocation3 + $0x8] sm:$0xff] }
 0x2d8   :  { %2999 = vmatpush.msrb.mxu1 %v4943_v13  ;;  %3040 = vmatpush.msrb.mxu2 %v4950_v53  ;;  %v5473_v53 = vld [vmem:[#allocation22_spill] sm:$0xff] }
 0x2d9   :  { %3103 = vmatpush.msrb.mxu3 %v4927_v10  ;;  %v2484_v8 = vand.u32 4294901760, %v2483_v29  ;;  %v2833_v6 = vsub.f32 %v5261_v40, %v2832_v28  ;;  %v5468_v10 = vld [vmem:[#allocation17_spill] sm:$0xff] }
 0x2da   :  { %3001 = vmatpush.msrb.mxu1 %v4956_v35  ;;  %3044 = vmatpush.msrb.mxu2 %v4965_v51 }
 0x2db   :  { %3105 = vmatpush.msrb.mxu3 %v4932_v25  ;;  %2485 = vmatmul.f32.vlgmr.msrb.gmra.mxu0 %v2484_v8  ;;  %v2834_v55 = vand.u32 4294901760, %v2833_v6  ;;  %v5470_v25 = vld [vmem:[#allocation19_spill] sm:$0xff] }
 0x2dc   :  { %2785 = vmatmul.f32.vlgmr.msra.gmra.mxu1 %v2480_v34  ;;  %2942 = vmatpush.msrb.mxu0 %v4930_v45  ;;  %v5469_v45 = vld [vmem:[#allocation18_spill] sm:$0xff] }
 0x2dd   :  { %3003 = vmatpush.msrb.mxu1 %v4972_v43  ;;  %3048 = vmatpush.msrb.mxu2 %v4981_v16 }
 0x2de   :  { %3107 = vmatpush.msrb.mxu3 %v4943_v13  ;;  %2835 = vmatmul.f32.vlgmr.msra.gmra.mxu2 %v2834_v55  ;;  %v5472_v13 = vld [vmem:[#allocation21_spill] sm:$0xff] }
 0x2df   :  { %2945 = vmatpush.msrb.mxu0 %v4940_v0  ;;  %3005 = vmatpush.msrb.mxu1 %v4984_v20  ;;  %v5471_v0 = vld [vmem:[#allocation20_spill] sm:$0xff] }
 0x2e0   :  { %3052 = vmatpush.msrb.mxu2 %v5002_v7  ;;  %3109 = vmatpush.msrb.mxu3 %v4956_v35 }
 0x2e1   :  { %2936 = vmatmul.f32.vlgmr.msra.gmra.mxu3 %v5257_v15  ;;  %2948 = vmatpush.msrb.mxu0 %v4953_v62  ;;  %v5474_v62 = vld [vmem:[#allocation23_spill] sm:$0xff] }
 0x2e2   :  { %3007 = vmatpush.msrb.mxu1 %v4999_v17  ;;  %3056 = vmatpush.msrb.mxu2 %v5010_v27 }
 0x2e3   :  { %3111 = vmatpush.msrb.mxu3 %v4972_v43  ;;  %2951 = vmatpush.msrb.mxu0 %v4968_v21 }
 0x2e4   :  { %3009 = vmatpush.msrb.mxu1 %v5015_v50  ;;  %3060 = vmatpush.msrb.mxu2 %v5026_v5 }
 0x2e5   :  { %3113 = vmatpush.msrb.mxu3 %v4984_v20  ;;  %2748 = vmatmul.f32.vlgmr.msra.gmra.mxu0 %v2480_v34 }
 0x2e6   :  { %2954 = vmatpush.msrb.mxu0 %v4987_v54  ;;  %3011 = vmatpush.msrb.mxu1 %v5031_v61 }
 0x2e7   :  { %3064 = vmatpush.msrb.mxu2 %v5043_v23  ;;  %3115 = vmatpush.msrb.mxu3 %v4999_v17 }
 0x2e8   :  { %2957 = vmatpush.msrb.mxu0 %v4997_v9  ;;  %3013 = vmatpush.msrb.mxu1 %v5051_v22 }
 0x2e9   :  { %3068 = vmatpush.msrb.mxu2 %v5058_v39  ;;  %3117 = vmatpush.msrb.mxu3 %v5015_v50 }
 0x2ea   :  { %2960 = vmatpush.msrb.mxu0 %v5013_v41  ;;  %3015 = vmatpush.msrb.mxu1 %v5060_v57 }
 0x2eb   :  { %3072 = vmatpush.msrb.mxu2 %v5082_v46  ;;  %3119 = vmatpush.msrb.mxu3 %v5031_v61 }
 0x2ec   :  { %2963 = vmatpush.msrb.mxu0 %v5029_v1  ;;  %3017 = vmatpush.msrb.mxu1 %v5076_v30 }
 0x2ed   :  { %3076 = vmatpush.msrb.mxu2 %v5088_v48  ;;  %3121 = vmatpush.msrb.mxu3 %v5051_v22 }
 0x2ee   :  { %2966 = vmatpush.msrb.mxu0 %v5468_v10  ;;  %3019 = vmatpush.msrb.mxu1 %v5093_v11 }
 0x2ef   :  { %3080 = vmatpush.msrb.mxu2 %v5104_v3  ;;  %3123 = vmatpush.msrb.mxu3 %v5060_v57 }
 0x2f0   :  { %2969 = vmatpush.msrb.mxu0 %v5469_v45  ;;  %3021 = vmatpush.msrb.mxu1 %v5109_v56 }
 0x2f1   :  { %3084 = vmatpush.msrb.mxu2 %v5122_v42  ;;  %3125 = vmatpush.msrb.mxu3 %v5076_v30 }
 0x2f2   :  { %2972 = vmatpush.msrb.mxu0 %v5470_v25  ;;  %3023 = vmatpush.msrb.mxu1 %v5131_v37 }
 0x2f3   :  { %3088 = vmatpush.msrb.mxu2 %v5138_v44  ;;  %3127 = vmatpush.msrb.mxu3 %v5093_v11 }
 0x2f4   :  { %2975 = vmatpush.msrb.mxu0 %v5471_v0  ;;  %3025 = vmatpush.msrb.mxu1 %v5140_v60 }
 0x2f5   :  { %3092 = vmatpush.msrb.mxu2 %v5160_v58  ;;  %3129 = vmatpush.msrb.mxu3 %v5109_v56 }
 0x2f6   :  { %3029 = vmatmul.f32.vlgmr.msrb.gmra.mxu1 %v2832_v28  ;;  %2978 = vmatpush.msrb.mxu0 %v5472_v13 }
 0x2f7   :  { %3096 = vmatpush.msrb.mxu2 %v5166_v32  ;;  %3131 = vmatpush.msrb.mxu3 %v5131_v37 }
 0x2f8   :  { %3098 = vmatmul.f32.vlgmr.msrb.gmra.mxu2 %v5257_v15  ;;  %2981 = vmatpush.msrb.mxu0 %v5473_v53 }
 0x2f9   :  { %3133 = vmatpush.msrb.mxu3 %v5140_v60 }
 0x2fa   :  { %3135 = vmatmul.f32.vlgmr.msrb.gmra.mxu3 %v5257_v15  ;;  %2984 = vmatpush.msrb.mxu0 %v5146_v49  ;;  %v3210_v15 = vld [vmem:[#allocation3] sm:$0xff] }
 0x2fc   :  { %2987 = vmatpush.msrb.mxu0 %v5474_v62 }
 0x2fd   :  { %2990 = vmatmul.f32.vlgmr.msrb.gmra.mxu0 %v5261_v40 }
 0x350   :  { %v2587_v51 = vpop.f32.mrf.mxu1 }
 0x358   :  { %v2486_v35 = vpop.f32.mrf.mxu0  ;;  %v2641_v21 = vpop.f32.mrf.mxu2 }
 0x359   :  { %v2588_v16 = vadd.f32 %v2587_v51, %v2486_v35  ;;  %v2786_v9 = vpop.f32.mrf.mxu1 }
 0x35a   :  { %v2680_v43 = vpop.f32.mrf.mxu3 }
 0x35b   :  { %v2642_v20 = vadd.f32 %v2641_v21, %v2588_v16 }
 0x35d   :  { %v2681_v17 = vadd.f32 %v2680_v43, %v2642_v20 }
 0x361   :  { %v2836_v7 = vpop.f32.mrf.mxu2 }
 0x362   :  { %v2749_v54 = vpop.f32.mrf.mxu0 }
 0x363   :  { %v2750_v41 = vadd.f32 %v2749_v54, %v2681_v17 }
 0x364   :  { %v2937_v27 = vpop.f32.mrf.mxu3 }
 0x365   :  { %v2938_v50 = vadd.f32 %v2937_v27, %v2836_v7  ;;  %v2787_v1 = vadd.f32 %v2786_v9, %v2750_v41 }
 0x367   :  { %v3139_v57 = vmul.f32 0.001953125, %v2787_v1 }
 0x369   :  { %v3141_v11 = vmul.f32 %v3139_v57, %v3139_v57 }
 0x373   :  { %v3030_v23 = vpop.f32.mrf.mxu1 }
 0x37a   :  { %v2991_v5 = vpop.f32.mrf.mxu0 }
 0x37b   :  { %v2992_v61 = vadd.f32 %v2991_v5, %v2938_v50  ;;  %v3099_v39 = vpop.f32.mrf.mxu2 }
 0x37d   :  { %v3031_v22 = vadd.f32 %v3030_v23, %v2992_v61  ;;  %v3136_v30 = vpop.f32.mrf.mxu3 }
 0x37f   :  { %v3100_v32 = vadd.f32 %v3099_v39, %v3031_v22 }
 0x381   :  { %v3137_v46 = vadd.f32 %v3136_v30, %v3100_v32 }
 0x383   :  { %v3140_v48 = vmul.f32 0.001953125, %v3137_v46 }
 0x385   :  { %v3142_v3 = vsub.f32 %v3140_v48, %v3141_v11 }
 0x387   :  { %v3143_v56 = vmax.f32 %v3142_v3, 0.0 }
 0x389   :  { %v3145_v42 = vadd.f32 1e-05, %v3143_v56 }
 0x38b   :  { %3208 = vrsqrt.f32 %v3145_v42  ;;  %vm3152_vm4 = vweird.f32 %v3145_v42 }
 0x391   :  { %v3209_v37 = vpop.eup %3208 }
 0x392   :  { %v3147_v44 = vmul.f32 %v3209_v37, %v3145_v42  ;;  %vm3153_vm3 = vweird.f32 %v3209_v37 }
 0x393   :  { %vm3154_vm5 = vmor %vm3152_vm4, %vm3153_vm3 }
 0x394   :  { %v3148_v60 = vmul.f32 %v3209_v37, %v3147_v44 }
 0x396   :  { %v3149_v49 = vmul.f32 0.5, %v3148_v60 }
 0x398   :  { %v3150_v58 = vsub.f32 1.5, %v3149_v49 }
 0x39a   :  { %v3151_v36 = vmul.f32 %v3209_v37, %v3150_v58 }
 0x39c   :  { %v3155_v38 = vsel %vm3154_vm5, %v3209_v37, %v3151_v36 }
 0x39d   :  { %v3156_v19 = vmul.f32 %v3155_v38, %v3144_v4 }
 0x39f   :  { %v3158_v63 = vmul.f32 %v3156_v19, %v3139_v57  ;;  %v3161_v52 = vperm.slane %v3156_v19, 0 }
 0x3a1   :  { %v3159_v24 = vsub.f32 %v3157_v18, %v3158_v63  ;;  %v3163_v59 = vmul.f32 %v3161_v52, %v5247_v47  ;;  %v3164_v31 = vmul.f32 %v3161_v52, %v5249_v2 }
 0x3a3   :  { %v3166_v12 = vperm.slane %v3159_v24, 0 }
 0x3a5   :  { %v3168_v26 = vadd.f32 %v3166_v12, %v3163_v59  ;;  %v3169_v34 = vadd.f32 %v3166_v12, %v3164_v31 }
 0x3a7   :  { %v3170_v33 = vadd.f32 %v3210_v15, %v3168_v26  ;;  %v3171_v40 = vadd.f32 %v3211_v14, %v3169_v34 }
 0x3a9   :  { %v3172_v29 = vmax.f32 %v3170_v33, 0.0  ;;  %v3173_v28 = vmax.f32 %v3171_v40, 0.0 }
 0x3ab   :  { %3174 = vst [vmem:[#allocation12] sm:$0xff] %v3172_v29 }
 0x3ac   :  { %3175 = vst [vmem:[#allocation12 + $0x8] sm:$0xff] %v3173_v28 }
 0x3ad   :  { %3188 = dma.vmem_to_hbm [thread:$0]  %s3181_s16, 256, %s3183_s8, [#allocation5], %s3365_s17, %s3365_s17, %s3366_s18  }
 0x3ae   :  { %3362 = dma.done.wait [#allocation5], 256  }
 0x3af   :  { %3363 = vsyncadd [#allocation5], 4294967040 }
 0x3b0   :  { %3193 = vsyncpa [#allocation4], 1 }
 0x3b1   :  { %3194 = vsyncpa [#allocation7], 1 }
 0x3b2   :  { %3195 = vsyncpa [#allocation10], 1 }
 0x3b3   :  { %3196 = vsyncpa [#allocation5], 1 }

</bundles_post_ra>
